<compile_context>
chip_gen: v6e
topology: v6e:2x2x1
jax: 0.10.0
libtpu: 0.0.40
codegen_flags: <defaults>
</compile_context>

<pallas_src>
import functools

import jax
import jax.numpy as jnp
from jax.experimental import pallas as pl
from jax.experimental.pallas import tpu as pltpu


# ------------------------------ fused kernel -------------------------------
def _dconv5_fused_kernel(x_ref, w_ref, s_ref, b_ref, o_ref, xp_ref,
                         *, H, WC, padh, dils):
    """Fused 5-layer dilated conv + folded BN + ReLU + residual chain.

    x_ref : (1, H, WC)          input activation, lane-dense (WC = W*C)
    w_ref : (3*len(dils), WC, WC)  per-layer, per-kh banded block weights
    s_ref : (len(dils), 1, WC)  folded BN scale (tiled over W)
    b_ref : (len(dils), 1, WC)  folded BN bias  (tiled over W)
    o_ref : (1, H, WC)          output (e5)
    xp_ref: (H + 2*padh, WC)    VMEM scratch, zero border = H zero-padding
    """
    # Zero the padded row buffer once; only its interior is rewritten below,
    # so the top/bottom zero rows provide the conv's zero padding in H.
    xp_ref[...] = jnp.zeros_like(xp_ref)

    cur = x_ref[0]          # e0 = x, (H, WC), f32, lane-dense (2 vregs)
    prev = None             # residual source e_{i-1}
    for li, d in enumerate(dils):
        # Write current activation into the (sublane-aligned) interior.
        xp_ref[padh:padh + H, :] = cur

        acc = jnp.zeros((H, WC), jnp.float32)
        for kh in range(3):
            r0 = padh + (kh - 1) * d            # static sublane offset
            tap = xp_ref[r0:r0 + H, :]          # slice the Ref, not a value
            acc = acc + jnp.dot(tap, w_ref[li * 3 + kh],
                                preferred_element_type=jnp.float32)

        y = acc * s_ref[li] + b_ref[li]         # folded BatchNorm (eval mode)
        y = jnp.maximum(y, 0.0)                 # ReLU
        if prev is not None:                    # residual AFTER ReLU (layers 2..5)
            y = y + prev
        prev, cur = cur, y

    o_ref[0] = cur.astype(o_ref.dtype)


# ------------------------------ host wrapper --------------------------------
def _build_layer_mats(w_hwio, W, d):
    """Fold kw-shift + W zero-padding into 3 banded (W*C, W*C) matrices."""
    mats = []
    for kh in range(3):
        m = None
        for kw in range(3):
            shift = (kw - 1) * d
            # sel[w_in, w_out] = 1  iff  w_in == w_out + shift (zero outside W)
            sel = jnp.eye(W, k=-shift, dtype=jnp.float32)
            term = jnp.kron(sel, w_hwio[kh, kw])
            m = term if m is None else m + term
        mats.append(m)
    return jnp.stack(mats)                       # (3, W*C, W*C)


def dconv5_pallas(x_nchw, params, dils=(1, 2, 1, 4, 1)):
    """Forward of DConv_5 with one fused Pallas kernel."""
    N, C, H, W = x_nchw.shape
    WC = W * C
    padh = 8                                     # >= max(dils), sublane-aligned
    assert padh >= max(dils)

    # NCHW -> lane-dense (N, H, W*C): single head transpose, single tail one.
    x = jnp.transpose(x_nchw, (0, 2, 3, 1)).reshape(N, H, WC)

    w_all, s_all, b_all = [], [], []
    for p, d in zip(params, dils):
        w_all.append(_build_layer_mats(p["w"], W, d))
        s_all.append(jnp.tile(p["scale"], W))    # lane index = w*C + c
        b_all.append(jnp.tile(p["bias"], W))
    w_all = jnp.concatenate(w_all, axis=0)       # (3*5, WC, WC)
    s_all = jnp.stack(s_all)[:, None, :]         # (5, 1, WC)
    b_all = jnp.stack(b_all)[:, None, :]         # (5, 1, WC)

    nl = len(dils)
    kernel = functools.partial(_dconv5_fused_kernel, H=H, WC=WC,
                               padh=padh, dils=tuple(dils))
    out = pl.pallas_call(
        kernel,
        out_shape=jax.ShapeDtypeStruct((N, H, WC), x.dtype),
        grid_spec=pltpu.PrefetchScalarGridSpec(
            num_scalar_prefetch=0,
            grid=(N,),
            in_specs=[
                pl.BlockSpec((1, H, WC), lambda b: (b, 0, 0)),
                pl.BlockSpec((3 * nl, WC, WC), lambda b: (0, 0, 0)),
                pl.BlockSpec((nl, 1, WC), lambda b: (0, 0, 0)),
                pl.BlockSpec((nl, 1, WC), lambda b: (0, 0, 0)),
            ],
            out_specs=pl.BlockSpec((1, H, WC), lambda b: (b, 0, 0)),
            scratch_shapes=[pltpu.VMEM((H + 2 * padh, WC), jnp.float32)],
        ),
        compiler_params=pltpu.CompilerParams(
            dimension_semantics=("parallel",)),
    )(x, w_all, s_all, b_all)

    return jnp.transpose(out.reshape(N, H, W, C), (0, 3, 1, 2))   # -> NCHW


# ------------------------------ parameters ----------------------------------
def make_layer_params(key, C, eps=1e-5):
    """Deterministic conv + BN params; BN folded into (scale, bias)."""
    kw_, kb, kg, kbe, km, kv = jax.random.split(key, 6)
    w = jax.random.normal(kw_, (3, 3, C, C), jnp.float32) * 0.1   # HWIO
    conv_b = jax.random.normal(kb, (C,), jnp.float32) * 0.05
    gamma = 1.0 + 0.1 * jax.random.normal(kg, (C,), jnp.float32)
    beta = 0.05 * jax.random.normal(kbe, (C,), jnp.float32)
    r_mean = 0.1 * jax.random.normal(km, (C,), jnp.float32)
    r_var = 1.0 + 0.1 * jax.random.uniform(kv, (C,), jnp.float32)
    scale = gamma / jnp.sqrt(r_var + eps)
    bias = (conv_b - r_mean) * scale + beta
    return dict(w=w, scale=scale, bias=bias, conv_b=conv_b, gamma=gamma,
                beta=beta, mean=r_mean, var=r_var, eps=eps)


# ---------------- pure-JAX reference (for correctness check) ----------------
def _ref_layer(x_nhwc, res_nhwc, p, d):
    y = jax.lax.conv_general_dilated(
        x_nhwc, p["w"], window_strides=(1, 1),
        padding=((d, d), (d, d)), rhs_dilation=(d, d),
        dimension_numbers=("NHWC", "HWIO", "NHWC"),
        precision=jax.lax.Precision.HIGHEST)
    y = y + p["conv_b"][None, None, None, :]
    y = (y - p["mean"]) / jnp.sqrt(p["var"] + p["eps"]) * p["gamma"] + p["beta"]
    y = jnp.maximum(y, 0.0)
    return y + res_nhwc


def dconv5_ref(x_nchw, params, dils=(1, 2, 1, 4, 1)):
    x = jnp.transpose(x_nchw, (0, 2, 3, 1))
    zeros = jnp.zeros_like(x)
    e1 = _ref_layer(x,  zeros, params[0], dils[0])
    e2 = _ref_layer(e1, x,     params[1], dils[1])
    e3 = _ref_layer(e2, e1,    params[2], dils[2])
    e4 = _ref_layer(e3, e2,    params[3], dils[3])
    e5 = _ref_layer(e4, e3,    params[4], dils[4])
    return jnp.transpose(e5, (0, 3, 1, 2))


if __name__ == "__main__":
    N, C, H, W = 2, 8, 16, 16        # W*C = 128 -> lane-dense activations
    key = jax.random.PRNGKey(0)
    kx, kp = jax.random.split(key)
    x = jax.random.normal(kx, (N, C, H, W), jnp.float32)

    layer_keys = jax.random.split(kp, 5)
    params = [make_layer_params(layer_keys[i], C) for i in range(5)]

    out = jax.block_until_ready(dconv5_pallas(x, params))
    ref = jax.block_until_ready(dconv5_ref(x, params))

    assert out.shape == (N, C, H, W), out.shape
    assert jnp.allclose(out, ref, atol=1e-3, rtol=1e-3), \
        float(jnp.max(jnp.abs(out - ref)))
    print("KERNEL_OK")
</pallas_src>

<mosaic_0001>
module attributes {stable_mosaic.version = 11 : i64} {
  func.func @_dconv5_fused_kernel(%arg0: i32, %arg1: memref<1x16x128xf32, #tpu.memory_space<vmem>>, %arg2: memref<15x128x128xf32, #tpu.memory_space<vmem>>, %arg3: memref<5x1x128xf32, #tpu.memory_space<vmem>>, %arg4: memref<5x1x128xf32, #tpu.memory_space<vmem>>, %arg5: memref<1x16x128xf32, #tpu.memory_space<vmem>>, %arg6: memref<32x128xf32, #tpu.memory_space<vmem>>) attributes {dimension_semantics = [#tpu.dimension_semantics<parallel>], iteration_bounds = array<i64: 2>, scalar_prefetch = 0 : i64, scratch_operands = 1 : i64, tpu.core_type = #tpu.core_type<tc>, window_params = [{transform_indices = @transform_0, window_bounds = array<i64: 1, 16, 128>}, {pipeline_mode = #tpu.pipeline_mode<synchronous>, transform_indices = @transform_1, window_bounds = array<i64: 15, 128, 128>}, {pipeline_mode = #tpu.pipeline_mode<synchronous>, transform_indices = @transform_2, window_bounds = array<i64: 5, 1, 128>}, {pipeline_mode = #tpu.pipeline_mode<synchronous>, transform_indices = @transform_3, window_bounds = array<i64: 5, 1, 128>}, {transform_indices = @transform_4, window_bounds = array<i64: 1, 16, 128>}]} {
    %cst = arith.constant 0.000000e+00 : f32
    %0 = vector.broadcast %cst : f32 to vector<32x128xf32>
    %c0 = arith.constant 0 : index
    %c0_0 = arith.constant 0 : index
    %1 = vector.load %arg6[%c0, %c0_0] : memref<32x128xf32, #tpu.memory_space<vmem>>, vector<32x128xf32>
    tpu.vector_store %arg6[%c0, %c0_0], %0 {strides = array<i32>} : memref<32x128xf32, #tpu.memory_space<vmem>>, vector<32x128xf32>,
    %c0_1 = arith.constant 0 : index
    %c0_2 = arith.constant 0 : index
    %c0_3 = arith.constant 0 : index
    %2 = vector.load %arg1[%c0_1, %c0_2, %c0_3] : memref<1x16x128xf32, #tpu.memory_space<vmem>>, vector<1x16x128xf32>
    %3 = vector.shape_cast %2 : vector<1x16x128xf32> to vector<16x128xf32>
    %c8 = arith.constant 8 : index
    %c0_4 = arith.constant 0 : index
    %4 = vector.load %arg6[%c8, %c0_4] : memref<32x128xf32, #tpu.memory_space<vmem>>, vector<16x128xf32>
    tpu.vector_store %arg6[%c8, %c0_4], %3 {strides = array<i32>} : memref<32x128xf32, #tpu.memory_space<vmem>>, vector<16x128xf32>,
    %cst_5 = arith.constant 0.000000e+00 : f32
    %5 = vector.broadcast %cst_5 : f32 to vector<16x128xf32>
    %c7 = arith.constant 7 : index
    %c0_6 = arith.constant 0 : index
    %6 = vector.load %arg6[%c7, %c0_6] : memref<32x128xf32, #tpu.memory_space<vmem>>, vector<16x128xf32>
    %c0_7 = arith.constant 0 : index
    %c0_8 = arith.constant 0 : index
    %c0_9 = arith.constant 0 : index
    %7 = vector.load %arg2[%c0_7, %c0_8, %c0_9] : memref<15x128x128xf32, #tpu.memory_space<vmem>>, vector<1x128x128xf32>
    %8 = vector.shape_cast %7 : vector<1x128x128xf32> to vector<128x128xf32>
    %cst_10 = arith.constant dense<0.000000e+00> : vector<16x128xf32>
    %9 = tpu.matmul %6, %8, %cst_10 {dimension_numbers = #tpu.dot_dimension_numbers<[1], [0], [0], [1], [0, 0, 1, 1], [], []>} : vector<16x128xf32>, vector<128x128xf32>, vector<16x128xf32> -> vector<16x128xf32>
    %10 = arith.addf %5, %9 : vector<16x128xf32>
    %c8_11 = arith.constant 8 : index
    %c0_12 = arith.constant 0 : index
    %11 = vector.load %arg6[%c8_11, %c0_12] : memref<32x128xf32, #tpu.memory_space<vmem>>, vector<16x128xf32>
    %c1 = arith.constant 1 : index
    %c0_13 = arith.constant 0 : index
    %c0_14 = arith.constant 0 : index
    %12 = vector.load %arg2[%c1, %c0_13, %c0_14] : memref<15x128x128xf32, #tpu.memory_space<vmem>>, vector<1x128x128xf32>
    %13 = vector.shape_cast %12 : vector<1x128x128xf32> to vector<128x128xf32>
    %cst_15 = arith.constant dense<0.000000e+00> : vector<16x128xf32>
    %14 = tpu.matmul %11, %13, %cst_15 {dimension_numbers = #tpu.dot_dimension_numbers<[1], [0], [0], [1], [0, 0, 1, 1], [], []>} : vector<16x128xf32>, vector<128x128xf32>, vector<16x128xf32> -> vector<16x128xf32>
    %15 = arith.addf %10, %14 : vector<16x128xf32>
    %c9 = arith.constant 9 : index
    %c0_16 = arith.constant 0 : index
    %16 = vector.load %arg6[%c9, %c0_16] : memref<32x128xf32, #tpu.memory_space<vmem>>, vector<16x128xf32>
    %c2 = arith.constant 2 : index
    %c0_17 = arith.constant 0 : index
    %c0_18 = arith.constant 0 : index
    %17 = vector.load %arg2[%c2, %c0_17, %c0_18] : memref<15x128x128xf32, #tpu.memory_space<vmem>>, vector<1x128x128xf32>
    %18 = vector.shape_cast %17 : vector<1x128x128xf32> to vector<128x128xf32>
    %cst_19 = arith.constant dense<0.000000e+00> : vector<16x128xf32>
    %19 = tpu.matmul %16, %18, %cst_19 {dimension_numbers = #tpu.dot_dimension_numbers<[1], [0], [0], [1], [0, 0, 1, 1], [], []>} : vector<16x128xf32>, vector<128x128xf32>, vector<16x128xf32> -> vector<16x128xf32>
    %20 = arith.addf %15, %19 : vector<16x128xf32>
    %c0_20 = arith.constant 0 : index
    %c0_21 = arith.constant 0 : index
    %c0_22 = arith.constant 0 : index
    %21 = vector.load %arg3[%c0_20, %c0_21, %c0_22] : memref<5x1x128xf32, #tpu.memory_space<vmem>>, vector<1x1x128xf32>
    %22 = vector.shape_cast %21 : vector<1x1x128xf32> to vector<1x128xf32>
    %23 = vector.broadcast %22 : vector<1x128xf32> to vector<16x128xf32>
    %24 = arith.mulf %20, %23 : vector<16x128xf32>
    %c0_23 = arith.constant 0 : index
    %c0_24 = arith.constant 0 : index
    %c0_25 = arith.constant 0 : index
    %25 = vector.load %arg4[%c0_23, %c0_24, %c0_25] : memref<5x1x128xf32, #tpu.memory_space<vmem>>, vector<1x1x128xf32>
    %26 = vector.shape_cast %25 : vector<1x1x128xf32> to vector<1x128xf32>
    %27 = vector.broadcast %26 : vector<1x128xf32> to vector<16x128xf32>
    %28 = arith.addf %24, %27 : vector<16x128xf32>
    %cst_26 = arith.constant 0.000000e+00 : f32
    %29 = vector.broadcast %cst_26 : f32 to vector<16x128xf32>
    %30 = arith.maximumf %28, %29 : vector<16x128xf32>
    %c8_27 = arith.constant 8 : index
    %c0_28 = arith.constant 0 : index
    %31 = vector.load %arg6[%c8_27, %c0_28] : memref<32x128xf32, #tpu.memory_space<vmem>>, vector<16x128xf32>
    tpu.vector_store %arg6[%c8_27, %c0_28], %30 {strides = array<i32>} : memref<32x128xf32, #tpu.memory_space<vmem>>, vector<16x128xf32>,
    %cst_29 = arith.constant 0.000000e+00 : f32
    %32 = vector.broadcast %cst_29 : f32 to vector<16x128xf32>
    %c6 = arith.constant 6 : index
    %c0_30 = arith.constant 0 : index
    %33 = vector.load %arg6[%c6, %c0_30] : memref<32x128xf32, #tpu.memory_space<vmem>>, vector<16x128xf32>
    %c3 = arith.constant 3 : index
    %c0_31 = arith.constant 0 : index
    %c0_32 = arith.constant 0 : index
    %34 = vector.load %arg2[%c3, %c0_31, %c0_32] : memref<15x128x128xf32, #tpu.memory_space<vmem>>, vector<1x128x128xf32>
    %35 = vector.shape_cast %34 : vector<1x128x128xf32> to vector<128x128xf32>
    %cst_33 = arith.constant dense<0.000000e+00> : vector<16x128xf32>
    %36 = tpu.matmul %33, %35, %cst_33 {dimension_numbers = #tpu.dot_dimension_numbers<[1], [0], [0], [1], [0, 0, 1, 1], [], []>} : vector<16x128xf32>, vector<128x128xf32>, vector<16x128xf32> -> vector<16x128xf32>
    %37 = arith.addf %32, %36 : vector<16x128xf32>
    %c8_34 = arith.constant 8 : index
    %c0_35 = arith.constant 0 : index
    %38 = vector.load %arg6[%c8_34, %c0_35] : memref<32x128xf32, #tpu.memory_space<vmem>>, vector<16x128xf32>
    %c4 = arith.constant 4 : index
    %c0_36 = arith.constant 0 : index
    %c0_37 = arith.constant 0 : index
    %39 = vector.load %arg2[%c4, %c0_36, %c0_37] : memref<15x128x128xf32, #tpu.memory_space<vmem>>, vector<1x128x128xf32>
    %40 = vector.shape_cast %39 : vector<1x128x128xf32> to vector<128x128xf32>
    %cst_38 = arith.constant dense<0.000000e+00> : vector<16x128xf32>
    %41 = tpu.matmul %38, %40, %cst_38 {dimension_numbers = #tpu.dot_dimension_numbers<[1], [0], [0], [1], [0, 0, 1, 1], [], []>} : vector<16x128xf32>, vector<128x128xf32>, vector<16x128xf32> -> vector<16x128xf32>
    %42 = arith.addf %37, %41 : vector<16x128xf32>
    %c10 = arith.constant 10 : index
    %c0_39 = arith.constant 0 : index
    %43 = vector.load %arg6[%c10, %c0_39] : memref<32x128xf32, #tpu.memory_space<vmem>>, vector<16x128xf32>
    %c5 = arith.constant 5 : index
    %c0_40 = arith.constant 0 : index
    %c0_41 = arith.constant 0 : index
    %44 = vector.load %arg2[%c5, %c0_40, %c0_41] : memref<15x128x128xf32, #tpu.memory_space<vmem>>, vector<1x128x128xf32>
    %45 = vector.shape_cast %44 : vector<1x128x128xf32> to vector<128x128xf32>
    %cst_42 = arith.constant dense<0.000000e+00> : vector<16x128xf32>
    %46 = tpu.matmul %43, %45, %cst_42 {dimension_numbers = #tpu.dot_dimension_numbers<[1], [0], [0], [1], [0, 0, 1, 1], [], []>} : vector<16x128xf32>, vector<128x128xf32>, vector<16x128xf32> -> vector<16x128xf32>
    %47 = arith.addf %42, %46 : vector<16x128xf32>
    %c1_43 = arith.constant 1 : index
    %c0_44 = arith.constant 0 : index
    %c0_45 = arith.constant 0 : index
    %48 = vector.load %arg3[%c1_43, %c0_44, %c0_45] : memref<5x1x128xf32, #tpu.memory_space<vmem>>, vector<1x1x128xf32>
    %49 = vector.shape_cast %48 : vector<1x1x128xf32> to vector<1x128xf32>
    %50 = vector.broadcast %49 : vector<1x128xf32> to vector<16x128xf32>
    %51 = arith.mulf %47, %50 : vector<16x128xf32>
    %c1_46 = arith.constant 1 : index
    %c0_47 = arith.constant 0 : index
    %c0_48 = arith.constant 0 : index
    %52 = vector.load %arg4[%c1_46, %c0_47, %c0_48] : memref<5x1x128xf32, #tpu.memory_space<vmem>>, vector<1x1x128xf32>
    %53 = vector.shape_cast %52 : vector<1x1x128xf32> to vector<1x128xf32>
    %54 = vector.broadcast %53 : vector<1x128xf32> to vector<16x128xf32>
    %55 = arith.addf %51, %54 : vector<16x128xf32>
    %cst_49 = arith.constant 0.000000e+00 : f32
    %56 = vector.broadcast %cst_49 : f32 to vector<16x128xf32>
    %57 = arith.maximumf %55, %56 : vector<16x128xf32>
    %58 = arith.addf %57, %3 : vector<16x128xf32>
    %c8_50 = arith.constant 8 : index
    %c0_51 = arith.constant 0 : index
    %59 = vector.load %arg6[%c8_50, %c0_51] : memref<32x128xf32, #tpu.memory_space<vmem>>, vector<16x128xf32>
    tpu.vector_store %arg6[%c8_50, %c0_51], %58 {strides = array<i32>} : memref<32x128xf32, #tpu.memory_space<vmem>>, vector<16x128xf32>,
    %cst_52 = arith.constant 0.000000e+00 : f32
    %60 = vector.broadcast %cst_52 : f32 to vector<16x128xf32>
    %c7_53 = arith.constant 7 : index
    %c0_54 = arith.constant 0 : index
    %61 = vector.load %arg6[%c7_53, %c0_54] : memref<32x128xf32, #tpu.memory_space<vmem>>, vector<16x128xf32>
    %c6_55 = arith.constant 6 : index
    %c0_56 = arith.constant 0 : index
    %c0_57 = arith.constant 0 : index
    %62 = vector.load %arg2[%c6_55, %c0_56, %c0_57] : memref<15x128x128xf32, #tpu.memory_space<vmem>>, vector<1x128x128xf32>
    %63 = vector.shape_cast %62 : vector<1x128x128xf32> to vector<128x128xf32>
    %cst_58 = arith.constant dense<0.000000e+00> : vector<16x128xf32>
    %64 = tpu.matmul %61, %63, %cst_58 {dimension_numbers = #tpu.dot_dimension_numbers<[1], [0], [0], [1], [0, 0, 1, 1], [], []>} : vector<16x128xf32>, vector<128x128xf32>, vector<16x128xf32> -> vector<16x128xf32>
    %65 = arith.addf %60, %64 : vector<16x128xf32>
    %c8_59 = arith.constant 8 : index
    %c0_60 = arith.constant 0 : index
    %66 = vector.load %arg6[%c8_59, %c0_60] : memref<32x128xf32, #tpu.memory_space<vmem>>, vector<16x128xf32>
    %c7_61 = arith.constant 7 : index
    %c0_62 = arith.constant 0 : index
    %c0_63 = arith.constant 0 : index
    %67 = vector.load %arg2[%c7_61, %c0_62, %c0_63] : memref<15x128x128xf32, #tpu.memory_space<vmem>>, vector<1x128x128xf32>
    %68 = vector.shape_cast %67 : vector<1x128x128xf32> to vector<128x128xf32>
    %cst_64 = arith.constant dense<0.000000e+00> : vector<16x128xf32>
    %69 = tpu.matmul %66, %68, %cst_64 {dimension_numbers = #tpu.dot_dimension_numbers<[1], [0], [0], [1], [0, 0, 1, 1], [], []>} : vector<16x128xf32>, vector<128x128xf32>, vector<16x128xf32> -> vector<16x128xf32>
    %70 = arith.addf %65, %69 : vector<16x128xf32>
    %c9_65 = arith.constant 9 : index
    %c0_66 = arith.constant 0 : index
    %71 = vector.load %arg6[%c9_65, %c0_66] : memref<32x128xf32, #tpu.memory_space<vmem>>, vector<16x128xf32>
    %c8_67 = arith.constant 8 : index
    %c0_68 = arith.constant 0 : index
    %c0_69 = arith.constant 0 : index
    %72 = vector.load %arg2[%c8_67, %c0_68, %c0_69] : memref<15x128x128xf32, #tpu.memory_space<vmem>>, vector<1x128x128xf32>
    %73 = vector.shape_cast %72 : vector<1x128x128xf32> to vector<128x128xf32>
    %cst_70 = arith.constant dense<0.000000e+00> : vector<16x128xf32>
    %74 = tpu.matmul %71, %73, %cst_70 {dimension_numbers = #tpu.dot_dimension_numbers<[1], [0], [0], [1], [0, 0, 1, 1], [], []>} : vector<16x128xf32>, vector<128x128xf32>, vector<16x128xf32> -> vector<16x128xf32>
    %75 = arith.addf %70, %74 : vector<16x128xf32>
    %c2_71 = arith.constant 2 : index
    %c0_72 = arith.constant 0 : index
    %c0_73 = arith.constant 0 : index
    %76 = vector.load %arg3[%c2_71, %c0_72, %c0_73] : memref<5x1x128xf32, #tpu.memory_space<vmem>>, vector<1x1x128xf32>
    %77 = vector.shape_cast %76 : vector<1x1x128xf32> to vector<1x128xf32>
    %78 = vector.broadcast %77 : vector<1x128xf32> to vector<16x128xf32>
    %79 = arith.mulf %75, %78 : vector<16x128xf32>
    %c2_74 = arith.constant 2 : index
    %c0_75 = arith.constant 0 : index
    %c0_76 = arith.constant 0 : index
    %80 = vector.load %arg4[%c2_74, %c0_75, %c0_76] : memref<5x1x128xf32, #tpu.memory_space<vmem>>, vector<1x1x128xf32>
    %81 = vector.shape_cast %80 : vector<1x1x128xf32> to vector<1x128xf32>
    %82 = vector.broadcast %81 : vector<1x128xf32> to vector<16x128xf32>
    %83 = arith.addf %79, %82 : vector<16x128xf32>
    %cst_77 = arith.constant 0.000000e+00 : f32
    %84 = vector.broadcast %cst_77 : f32 to vector<16x128xf32>
    %85 = arith.maximumf %83, %84 : vector<16x128xf32>
    %86 = arith.addf %85, %30 : vector<16x128xf32>
    %c8_78 = arith.constant 8 : index
    %c0_79 = arith.constant 0 : index
    %87 = vector.load %arg6[%c8_78, %c0_79] : memref<32x128xf32, #tpu.memory_space<vmem>>, vector<16x128xf32>
    tpu.vector_store %arg6[%c8_78, %c0_79], %86 {strides = array<i32>} : memref<32x128xf32, #tpu.memory_space<vmem>>, vector<16x128xf32>,
    %cst_80 = arith.constant 0.000000e+00 : f32
    %88 = vector.broadcast %cst_80 : f32 to vector<16x128xf32>
    %c4_81 = arith.constant 4 : index
    %c0_82 = arith.constant 0 : index
    %89 = vector.load %arg6[%c4_81, %c0_82] : memref<32x128xf32, #tpu.memory_space<vmem>>, vector<16x128xf32>
    %c9_83 = arith.constant 9 : index
    %c0_84 = arith.constant 0 : index
    %c0_85 = arith.constant 0 : index
    %90 = vector.load %arg2[%c9_83, %c0_84, %c0_85] : memref<15x128x128xf32, #tpu.memory_space<vmem>>, vector<1x128x128xf32>
    %91 = vector.shape_cast %90 : vector<1x128x128xf32> to vector<128x128xf32>
    %cst_86 = arith.constant dense<0.000000e+00> : vector<16x128xf32>
    %92 = tpu.matmul %89, %91, %cst_86 {dimension_numbers = #tpu.dot_dimension_numbers<[1], [0], [0], [1], [0, 0, 1, 1], [], []>} : vector<16x128xf32>, vector<128x128xf32>, vector<16x128xf32> -> vector<16x128xf32>
    %93 = arith.addf %88, %92 : vector<16x128xf32>
    %c8_87 = arith.constant 8 : index
    %c0_88 = arith.constant 0 : index
    %94 = vector.load %arg6[%c8_87, %c0_88] : memref<32x128xf32, #tpu.memory_space<vmem>>, vector<16x128xf32>
    %c10_89 = arith.constant 10 : index
    %c0_90 = arith.constant 0 : index
    %c0_91 = arith.constant 0 : index
    %95 = vector.load %arg2[%c10_89, %c0_90, %c0_91] : memref<15x128x128xf32, #tpu.memory_space<vmem>>, vector<1x128x128xf32>
    %96 = vector.shape_cast %95 : vector<1x128x128xf32> to vector<128x128xf32>
    %cst_92 = arith.constant dense<0.000000e+00> : vector<16x128xf32>
    %97 = tpu.matmul %94, %96, %cst_92 {dimension_numbers = #tpu.dot_dimension_numbers<[1], [0], [0], [1], [0, 0, 1, 1], [], []>} : vector<16x128xf32>, vector<128x128xf32>, vector<16x128xf32> -> vector<16x128xf32>
    %98 = arith.addf %93, %97 : vector<16x128xf32>
    %c12 = arith.constant 12 : index
    %c0_93 = arith.constant 0 : index
    %99 = vector.load %arg6[%c12, %c0_93] : memref<32x128xf32, #tpu.memory_space<vmem>>, vector<16x128xf32>
    %c11 = arith.constant 11 : index
    %c0_94 = arith.constant 0 : index
    %c0_95 = arith.constant 0 : index
    %100 = vector.load %arg2[%c11, %c0_94, %c0_95] : memref<15x128x128xf32, #tpu.memory_space<vmem>>, vector<1x128x128xf32>
    %101 = vector.shape_cast %100 : vector<1x128x128xf32> to vector<128x128xf32>
    %cst_96 = arith.constant dense<0.000000e+00> : vector<16x128xf32>
    %102 = tpu.matmul %99, %101, %cst_96 {dimension_numbers = #tpu.dot_dimension_numbers<[1], [0], [0], [1], [0, 0, 1, 1], [], []>} : vector<16x128xf32>, vector<128x128xf32>, vector<16x128xf32> -> vector<16x128xf32>
    %103 = arith.addf %98, %102 : vector<16x128xf32>
    %c3_97 = arith.constant 3 : index
    %c0_98 = arith.constant 0 : index
    %c0_99 = arith.constant 0 : index
    %104 = vector.load %arg3[%c3_97, %c0_98, %c0_99] : memref<5x1x128xf32, #tpu.memory_space<vmem>>, vector<1x1x128xf32>
    %105 = vector.shape_cast %104 : vector<1x1x128xf32> to vector<1x128xf32>
    %106 = vector.broadcast %105 : vector<1x128xf32> to vector<16x128xf32>
    %107 = arith.mulf %103, %106 : vector<16x128xf32>
    %c3_100 = arith.constant 3 : index
    %c0_101 = arith.constant 0 : index
    %c0_102 = arith.constant 0 : index
    %108 = vector.load %arg4[%c3_100, %c0_101, %c0_102] : memref<5x1x128xf32, #tpu.memory_space<vmem>>, vector<1x1x128xf32>
    %109 = vector.shape_cast %108 : vector<1x1x128xf32> to vector<1x128xf32>
    %110 = vector.broadcast %109 : vector<1x128xf32> to vector<16x128xf32>
    %111 = arith.addf %107, %110 : vector<16x128xf32>
    %cst_103 = arith.constant 0.000000e+00 : f32
    %112 = vector.broadcast %cst_103 : f32 to vector<16x128xf32>
    %113 = arith.maximumf %111, %112 : vector<16x128xf32>
    %114 = arith.addf %113, %58 : vector<16x128xf32>
    %c8_104 = arith.constant 8 : index
    %c0_105 = arith.constant 0 : index
    %115 = vector.load %arg6[%c8_104, %c0_105] : memref<32x128xf32, #tpu.memory_space<vmem>>, vector<16x128xf32>
    tpu.vector_store %arg6[%c8_104, %c0_105], %114 {strides = array<i32>} : memref<32x128xf32, #tpu.memory_space<vmem>>, vector<16x128xf32>,
    %cst_106 = arith.constant 0.000000e+00 : f32
    %116 = vector.broadcast %cst_106 : f32 to vector<16x128xf32>
    %c7_107 = arith.constant 7 : index
    %c0_108 = arith.constant 0 : index
    %117 = vector.load %arg6[%c7_107, %c0_108] : memref<32x128xf32, #tpu.memory_space<vmem>>, vector<16x128xf32>
    %c12_109 = arith.constant 12 : index
    %c0_110 = arith.constant 0 : index
    %c0_111 = arith.constant 0 : index
    %118 = vector.load %arg2[%c12_109, %c0_110, %c0_111] : memref<15x128x128xf32, #tpu.memory_space<vmem>>, vector<1x128x128xf32>
    %119 = vector.shape_cast %118 : vector<1x128x128xf32> to vector<128x128xf32>
    %cst_112 = arith.constant dense<0.000000e+00> : vector<16x128xf32>
    %120 = tpu.matmul %117, %119, %cst_112 {dimension_numbers = #tpu.dot_dimension_numbers<[1], [0], [0], [1], [0, 0, 1, 1], [], []>} : vector<16x128xf32>, vector<128x128xf32>, vector<16x128xf32> -> vector<16x128xf32>
    %121 = arith.addf %116, %120 : vector<16x128xf32>
    %c8_113 = arith.constant 8 : index
    %c0_114 = arith.constant 0 : index
    %122 = vector.load %arg6[%c8_113, %c0_114] : memref<32x128xf32, #tpu.memory_space<vmem>>, vector<16x128xf32>
    %c13 = arith.constant 13 : index
    %c0_115 = arith.constant 0 : index
    %c0_116 = arith.constant 0 : index
    %123 = vector.load %arg2[%c13, %c0_115, %c0_116] : memref<15x128x128xf32, #tpu.memory_space<vmem>>, vector<1x128x128xf32>
    %124 = vector.shape_cast %123 : vector<1x128x128xf32> to vector<128x128xf32>
    %cst_117 = arith.constant dense<0.000000e+00> : vector<16x128xf32>
    %125 = tpu.matmul %122, %124, %cst_117 {dimension_numbers = #tpu.dot_dimension_numbers<[1], [0], [0], [1], [0, 0, 1, 1], [], []>} : vector<16x128xf32>, vector<128x128xf32>, vector<16x128xf32> -> vector<16x128xf32>
    %126 = arith.addf %121, %125 : vector<16x128xf32>
    %c9_118 = arith.constant 9 : index
    %c0_119 = arith.constant 0 : index
    %127 = vector.load %arg6[%c9_118, %c0_119] : memref<32x128xf32, #tpu.memory_space<vmem>>, vector<16x128xf32>
    %c14 = arith.constant 14 : index
    %c0_120 = arith.constant 0 : index
    %c0_121 = arith.constant 0 : index
    %128 = vector.load %arg2[%c14, %c0_120, %c0_121] : memref<15x128x128xf32, #tpu.memory_space<vmem>>, vector<1x128x128xf32>
    %129 = vector.shape_cast %128 : vector<1x128x128xf32> to vector<128x128xf32>
    %cst_122 = arith.constant dense<0.000000e+00> : vector<16x128xf32>
    %130 = tpu.matmul %127, %129, %cst_122 {dimension_numbers = #tpu.dot_dimension_numbers<[1], [0], [0], [1], [0, 0, 1, 1], [], []>} : vector<16x128xf32>, vector<128x128xf32>, vector<16x128xf32> -> vector<16x128xf32>
    %131 = arith.addf %126, %130 : vector<16x128xf32>
    %c4_123 = arith.constant 4 : index
    %c0_124 = arith.constant 0 : index
    %c0_125 = arith.constant 0 : index
    %132 = vector.load %arg3[%c4_123, %c0_124, %c0_125] : memref<5x1x128xf32, #tpu.memory_space<vmem>>, vector<1x1x128xf32>
    %133 = vector.shape_cast %132 : vector<1x1x128xf32> to vector<1x128xf32>
    %134 = vector.broadcast %133 : vector<1x128xf32> to vector<16x128xf32>
    %135 = arith.mulf %131, %134 : vector<16x128xf32>
    %c4_126 = arith.constant 4 : index
    %c0_127 = arith.constant 0 : index
    %c0_128 = arith.constant 0 : index
    %136 = vector.load %arg4[%c4_126, %c0_127, %c0_128] : memref<5x1x128xf32, #tpu.memory_space<vmem>>, vector<1x1x128xf32>
    %137 = vector.shape_cast %136 : vector<1x1x128xf32> to vector<1x128xf32>
    %138 = vector.broadcast %137 : vector<1x128xf32> to vector<16x128xf32>
    %139 = arith.addf %135, %138 : vector<16x128xf32>
    %cst_129 = arith.constant 0.000000e+00 : f32
    %140 = vector.broadcast %cst_129 : f32 to vector<16x128xf32>
    %141 = arith.maximumf %139, %140 : vector<16x128xf32>
    %142 = arith.addf %141, %86 : vector<16x128xf32>
    %c0_130 = arith.constant 0 : index
    %c0_131 = arith.constant 0 : index
    %c0_132 = arith.constant 0 : index
    %143 = vector.load %arg5[%c0_130, %c0_131, %c0_132] : memref<1x16x128xf32, #tpu.memory_space<vmem>>, vector<1x16x128xf32>
    %144 = vector.shape_cast %143 : vector<1x16x128xf32> to vector<16x128xf32>
    %145 = vector.shape_cast %142 : vector<16x128xf32> to vector<1x16x128xf32>
    tpu.vector_store %arg5[%c0_130, %c0_131, %c0_132], %145 {strides = array<i32>} : memref<1x16x128xf32, #tpu.memory_space<vmem>>, vector<1x16x128xf32>,
    return
  }
  func.func @transform_0(%arg0: i32) -> (i32, i32, i32) {
    %c0_i32 = arith.constant 0 : i32
    %c0_i32_0 = arith.constant 0 : i32
    %c0_i32_1 = arith.constant 0 : i32
    return %arg0, %c0_i32, %c0_i32_0 : i32, i32, i32
  }
  func.func @transform_1(%arg0: i32) -> (i32, i32, i32) {
    %c0_i32 = arith.constant 0 : i32
    %c0_i32_0 = arith.constant 0 : i32
    %c0_i32_1 = arith.constant 0 : i32
    %c0_i32_2 = arith.constant 0 : i32
    return %c0_i32, %c0_i32_0, %c0_i32_1 : i32, i32, i32
  }
  func.func @transform_2(%arg0: i32) -> (i32, i32, i32) {
    %c0_i32 = arith.constant 0 : i32
    %c0_i32_0 = arith.constant 0 : i32
    %c0_i32_1 = arith.constant 0 : i32
    %c0_i32_2 = arith.constant 0 : i32
    return %c0_i32, %c0_i32_0, %c0_i32_1 : i32, i32, i32
  }
  func.func @transform_3(%arg0: i32) -> (i32, i32, i32) {
    %c0_i32 = arith.constant 0 : i32
    %c0_i32_0 = arith.constant 0 : i32
    %c0_i32_1 = arith.constant 0 : i32
    %c0_i32_2 = arith.constant 0 : i32
    return %c0_i32, %c0_i32_0, %c0_i32_1 : i32, i32, i32
  }
  func.func @transform_4(%arg0: i32) -> (i32, i32, i32) {
    %c0_i32 = arith.constant 0 : i32
    %c0_i32_0 = arith.constant 0 : i32
    %c0_i32_1 = arith.constant 0 : i32
    return %arg0, %c0_i32, %c0_i32_0 : i32, i32, i32
  }
}

</mosaic_0001>

<bundles_post_ra>
// kernel: tpu_custom_call.1
= control target key start
LH: loop header
LB: loop body
LE: loop exit
PB: predicated region body
PF: predicated region fallthrough
CT: control target
= control target key end

     0   :  { %9 = vsyncpa [#allocation4], 0  ;;  %s3258_s0 = inlined_call_operand.hbm [shape: f32[2,16,128], index: 0, kind: input, shape index: {}]   ;;  %s3259_s1 = inlined_call_operand.hbm [shape: f32[15,128,128], index: 1, kind: input, shape index: {}]   ;;  %s3260_s2 = inlined_call_operand.hbm [shape: f32[5,1,128], index: 2, kind: input, shape index: {}]   ;;  %s3261_s3 = inlined_call_operand.vmem [shape: f32[5,1,128], index: 3, kind: input, shape index: {}]   ;;  %s3262_s4 = inlined_call_operand.hbm [shape: f32[2,16,128], index: 4, kind: output, shape index: {}]  }
   0x1   :  { %11 = vsyncpa [#allocation4 + $0x1], 0 }
   0x2   :  { %12 = vsyncpa [#allocation7], 0 }
   0x3   :  { %13 = vsyncpa [#allocation5], 0 }
   0x4   :  { %15 = vsyncpa [#allocation5 + $0x1], 0  ;;  %s2993_s15 = smov 0   ;;  %s2995_s16 = smov 0  }
   0x5   :  { %s2997_s17 = smov 0   ;;  %s2999_s18 = smov 0  }
   0x6 LB: > { %s3014_s19 = sadd.s32 4294967295, %s2955_s18   ;;  %s1904_s20 = sadd.s32 4294967294, %s2955_s18   ;;  %s2955_s18 = sphi %s2999_s18, %s3283_s18   ;;  %s2951_s17 = sphi %s2997_s17, %s3282_s17   ;;  %s2947_s16 = sphi %s2995_s16, %s3281_s16   ;;  %s2943_s15 = sphi %s2993_s15, %s3280_s15  }
   0x7   : > { %p41_p0 = scmp.ne.s32.totalorder %s2947_s16, %s2943_s15  ;;  %p3263_p1 = scmp.eq.s32.totalorder %s3014_s19, 0 }
   0x8   : > { %p128_p2 = scmp.eq.s32.totalorder %s3014_s19, 1  ;;  %p134_p3 = scmp.eq.s32.totalorder %s1904_s20, 1 }
   0x9   : > { %p3023_p4 = por %p3263_p1, %p41_p0  ;;  %p1905_p5 = scmp.ge.s32.totalorder %s2955_s18, 1 }
   0xa   : > { %p3028_p6 = por %p134_p3, %p41_p0  ;;  %p141_p7 = scmp.lt.s32.totalorder %s2955_s18, 3 }
   0xb   : > { %s3267_s21 = scalar_select %p3023_p4, 1, 0 }
   0xc   : > { %s3268_s22 = scalar_select %p3028_p6, 1, 0 }
   0xd   : > { %p3033_p8 = pnand %p1905_p5, %p141_p7  ;;  %s2957_s24 = smov [#allocation6]  }
   0xe   : > { %s153_s25 = sshll.u32 %s2957_s24, 4  ;;  %s2958_s27 = smov [#allocation8]   ;;  %s154_s25 = int_to_ptr.vmem [resolvable:$true] %s153_s25 }
   0xf   : > { %s3269_s23 = scalar_select %p3033_p8, 1, 0 }
  0x10   : > { %p2745_p9 = pneg %p3033_p8  ;;  %s166_s28 = sshll.u32 %s2958_s27, 4  ;;  %s3046_s28 = int_to_ptr.vmem [resolvable:$true] %s166_s28 }
  0x11   : > { %s2818_s29 = scalar_lea.vmem %s154_s25, 30720  ;;  %p2826_p5 = scmp.lt.s32.totalorder %s154_s25, %s154_s25 }
  0x12   : > { %p3042_p11 = pnand %p2745_p9, %p3263_p1  ;;  %p2819_p13 = scmp.ne.s32.totalorder %s154_s25, %s2818_s29 }
  0x13   : > { %p2827_p7 = scmp.lt.s32.totalorder %s2818_s29, %s2818_s29 }
  0x14   : > { %p2809_p12 = pneg %p3042_p11 }
  0x15   : > { %p2828_p9 = por %p2827_p7, %p2826_p5 }
  0x16   : > { %p2821_p0 = pnand %p2819_p13, %p2809_p12 }
  0x18   : > { %p2822_p3 = pneg %p2821_p0 }
  0x1a   : > { %p2829_p10 = pnand %p2828_p9, %p2822_p3 }
  0x1c   : > { %2832 = shalt.err (!%p2829_p10)
}
  0x1d   : > { %s2959_s30 = smov 128   ;;  %s2960_s5 = smov 8  }
  0x1e   : > { %2748 = dma.hbm_to_vmem [thread:$0]  (!%p3042_p11), %s3259_s1, 30720, %s154_s25, [#allocation7], %s2959_s30, %s2959_s30, %s2960_s5  }
  0x1f   : > { %s2844_s8 = scalar_lea.vmem %s3046_s28, 80  ;;  %s2851_s9 = scalar_lea.vmem %s3046_s28, 96 }
  0x20   : > { %p2845_p13 = scmp.ne.s32.totalorder %s3046_s28, %s2844_s8  ;;  %p2852_p3 = scmp.lt.s32.totalorder %s3046_s28, %s3046_s28 }
  0x21   : > { %p2853_p5 = scmp.lt.s32.totalorder %s2851_s9, %s2844_s8 }
  0x22   : > { %p2847_p10 = pnand %p2845_p13, %p2809_p12 }
  0x23   : > { %p2854_p7 = por %p2853_p5, %p2852_p3 }
  0x24   : > { %p2848_p0 = pneg %p2847_p10 }
  0x26   : > { %p2855_p9 = pnand %p2854_p7, %p2848_p0 }
  0x28   : > { %2858 = shalt.err (!%p2855_p9)
}
  0x29   : > { %s2961_s10 = smov 16   ;;  %s2962_s11 = smov 1  }
  0x2a   : > { %2751 = dma.hbm_to_vmem [thread:$0]  (!%p3042_p11), %s3260_s2, 80, %s3046_s28, [#allocation7], %s2961_s10, %s2961_s10, %s2962_s11  }
  0x2b   : > { %s3076_s14 = sadd.s32 1, %s2955_s18   ;;  %s28_s24 = sadd.s32 1, %s2951_s17 }
  0x2c   : > { %s25_s20 = ssub.s32 %s2955_s18, %s3076_s14  ;;  %p35_p13 = scmp.ne.s32.totalorder %s2951_s17, %s2947_s16 }
  0x2d   : > { %p26_p12 = scmp.eq.s32.totalorder %s25_s20, 0  ;;  %p36_p10 = scmp.eq.s32.totalorder %s2955_s18, 0 }
  0x2e   : > { %p3089_p3 = por %p128_p2, %p35_p13  ;;  %p2762_p5 = scmp.lt.s32.totalorder %s2955_s18, 2 }
  0x2f   : > { %s3085_s25 = scalar_select %p26_p12, %s2951_s17, %s28_s24  }
  0x30   : > { %p37_p0 = por %p36_p10, %p35_p13  ;;  %s183_s26 = sand.u32 1, %s2951_s17  }
  0x31   : > { %s3271_s27 = scalar_select %p3089_p3, 1, 0 }
  0x32   : > { %s1909_s29 = sshll.u32 %s183_s26, 4  ;;  %s1936_s28 = sshll.u32 %s2955_s18, 8 }
  0x33   : > { %s3099_s8 = scalar_lea.hbm %s3258_s0, %s1936_s28  ;;  %s187_s9 = scalar_lea.vmem [#allocation3], %s1909_s29 }
  0x34   : > { %s194_s10 = sshll.u32 %s187_s9, 4  ;;  %p3103_p2 = pnand %p2762_p5, %p37_p0  ;;  %s3101_s10 = int_to_ptr.vmem [resolvable:$true] %s194_s10 }
  0x35   : > { %s3107_s12 = scalar_lea.sflag [#allocation4], %s183_s26  ;;  %s2859_s13 = scalar_lea.hbm %s3099_s8, 256 }
  0x36   : > { %p2860_p11 = scmp.ne.s32.totalorder %s3099_s8, %s2859_s13  ;;  %p2861_p7 = pneg %p3103_p2 }
  0x37   : > { %s2864_s29 = scalar_lea.hbm %s3258_s0, 512  ;;  %p2865_p13 = scmp.lt.s32.totalorder %s3099_s8, %s3258_s0 }
  0x38   : > { %p2862_p9 = pnand %p2861_p7, %p2860_p11  ;;  %p2866_p10 = scmp.lt.s32.totalorder %s2864_s29, %s2859_s13 }
  0x3a   : > { %p2863_p12 = pneg %p2862_p9  ;;  %p2867_p0 = por %p2866_p10, %p2865_p13 }
  0x3c   : > { %p2868_p5 = pnand %p2867_p0, %p2863_p12 }
  0x3e   : > { %2871 = shalt.err (!%p2868_p5)
}
  0x3f   : > { %s2872_s26 = scalar_lea.vmem %s3101_s10, 256  ;;  %s2963_s7 = smov [#allocation3]  }
  0x40   : > { %p2873_p1 = scmp.ne.s32.totalorder %s3101_s10, %s2872_s26  ;;  %s2877_s9 = sshll.u32 %s2963_s7, 4  ;;  %s2878_s9 = int_to_ptr.vmem [resolvable:$false] %s2877_s9 }
  0x41   : > { %s2879_s20 = scalar_lea.vmem %s2878_s9, 512  ;;  %p2880_p9 = scmp.lt.s32.totalorder %s3101_s10, %s2878_s9 }
  0x42   : > { %p2875_p6 = pnand %p2873_p1, %p2861_p7  ;;  %p2881_p3 = scmp.lt.s32.totalorder %s2879_s20, %s2872_s26 }
  0x44   : > { %p2876_p11 = pneg %p2875_p6  ;;  %p2882_p4 = por %p2881_p3, %p2880_p9 }
  0x46   : > { %p2883_p8 = pnand %p2882_p4, %p2876_p11 }
  0x48   : > { %2886 = shalt.err (!%p2883_p8)
}
  0x49   : > { %2755 = dma.hbm_to_vmem [thread:$0]  (!%p3103_p2), %s3099_s8, 256, %s3101_s10, %s3107_s12, %s2959_s30, %s2959_s30, %s2960_s5  }
  0x4a   : > { %p3273_p1 = scmp.ne.s32.totalorder %s3269_s23, 0 }
  0x4b   : > { %s3134_s13 = sand.u32 (!%p3273_p1), 1, %s2947_s16   ;;  %p3274_p4 = scmp.ne.s32.totalorder (!%p3273_p1), %s3267_s21, 0 }
  0x4c   : > { %206 = sbr.rel (%p3273_p1) target bundleno = 1325 (0x52d), region = 36  ;;  %s1913_s24 = sshll.u32 (!%p3273_p1), %s3134_s13, 4 }
  0x4d   : > { %s209_s29 = scalar_lea.sflag (!%p3273_p1), [#allocation4], %s3134_s13  ;;  %s3140_s11 = scalar_lea.vmem (!%p3273_p1), [#allocation3], %s1913_s24 }
  0x51   : > { %2930 = dma.done.wait (%p3274_p4), %s209_s29, 256  }
  0x52   : > { %2932 = vsyncadd (%p3274_p4), %s209_s29, 4294967040  ;;  %p3275_p6 = scmp.eq.s32.totalorder %s3014_s19, 0 }
  0x54   : > { %2934 = dma.done.wait (%p3275_p6), [#allocation7], 30800   ;;  %p3276_p8 = pmov %p3275_p6 }
  0x55   : > { %v2964_v0 = vmov 0.0   ;;  %v289_v1 = vld [vmem:[#allocation6 + $0xf8] sm:$0xff]  ;;  %v288_v3 = vld [vmem:[#allocation6 + $0xf0] sm:$0xff]  ;;  %v287_v5 = vld [vmem:[#allocation6 + $0xe8] sm:$0xff]  ;;  %s1937_s7 = sshll.u32 %s3014_s19, 8  ;;  %s244_s9 = scalar_lea.vmem [#allocation9], %s1913_s24 }
  0x56   : > { %2936 = vsyncadd (%p3276_p8), [#allocation7], 4294936496  ;;  %245 = vst [vmem:[#allocation2] sm:$0xff] %v2964_v0  ;;  %v270_v2 = vld [vmem:[#allocation6 + $0x78] sm:$0xff]  ;;  %2208 = vmatprep.subr.mxu0 %v289_v1  ;;  %v269_v4 = vld [vmem:[#allocation6 + $0x70] sm:$0xff]  ;;  %s1812_s20 = sshll.u32 %s244_s9, 4  ;;  %s3212_s21 = scalar_lea.hbm %s3262_s4, %s1937_s7  ;;  %s3214_s20 = int_to_ptr.vmem [resolvable:$true] %s1812_s20 }
  0x57   : > { %248 = vst [vmem:[#allocation2 + $0x18] sm:$0xff] %v2964_v0  ;;  %2243 = vmatprep.subr.mxu1 %v270_v2  ;;  %2209 = vmatpush3.msra.mxu0 %v289_v1  ;;  %v268_v6 = vld [vmem:[#allocation6 + $0x68] sm:$0xff]  ;;  %v286_v7 = vld [vmem:[#allocation6 + $0xe0] sm:$0xff]  ;;  %v285_v9 = vld [vmem:[#allocation6 + $0xd8] sm:$0xff]  ;;  %s1799_s19 = scalar_lea.sflag [#allocation5], %s3134_s13  ;;  %s2887_s24 = scalar_lea.vmem %s3214_s20, 256 }
  0x58   : > { %2244 = vmatpush3.msra.mxu1 %v270_v2  ;;  %2210 = vmatprep.subr.mxu0 %v288_v3  ;;  %v267_v8 = vld [vmem:[#allocation6 + $0x60] sm:$0xff]  ;;  %v266_v10 = vld [vmem:[#allocation6 + $0x58] sm:$0xff]  ;;  %v284_v11 = vld [vmem:[#allocation6 + $0xd0] sm:$0xff]  ;;  %p2888_p3 = scmp.ne.s32.totalorder %s3214_s20, %s2887_s24  ;;  %p3277_p2 = scmp.ne.s32.totalorder %s3271_s27, 0 }
  0x59   : > { %2245 = vmatprep.subr.mxu1 %v269_v4  ;;  %2211 = vmatpush3.msra.mxu0 %v288_v3  ;;  %v265_v12 = vld [vmem:[#allocation6 + $0x50] sm:$0xff]  ;;  %v283_v13 = vld [vmem:[#allocation6 + $0xc8] sm:$0xff]  ;;  %v282_v17 = vld [vmem:[#allocation6 + $0xc0] sm:$0xff]  ;;  %s2965_s23 = smov [#allocation9]  }
  0x5a   : > { %2246 = vmatpush3.msra.mxu1 %v269_v4  ;;  %2212 = vmatprep.subr.mxu0 %v287_v5  ;;  %v264_v14 = vld [vmem:[#allocation6 + $0x48] sm:$0xff]  ;;  %v3151_v15 = vld [vmem:[%s3140_s11] sm:$0xff]  ;;  %v281_v19 = vld [vmem:[#allocation6 + $0xb8] sm:$0xff]  ;;  %p2889_p7 = pnand %p2888_p3, %p3277_p2  ;;  %s2891_s30 = sshll.u32 %s2965_s23, 4  ;;  %s2892_s30 = int_to_ptr.vmem [resolvable:$false] %s2891_s30 }
  0x5b   : > { %2247 = vmatprep.subr.mxu1 %v268_v6  ;;  %2213 = vmatpush3.msra.mxu0 %v287_v5  ;;  %251 = vst [vmem:[#allocation2 + $0x8] sm:$0xff] %v3151_v15  ;;  %v3155_v16 = vld [vmem:[%s3140_s11 + $0x8] sm:$0xff]  ;;  %v263_v18 = vld [vmem:[#allocation6 + $0x40] sm:$0xff]  ;;  %v280_v21 = vld [vmem:[#allocation6 + $0xb0] sm:$0xff]  ;;  %s2893_s5 = scalar_lea.vmem %s2892_s30, 512  ;;  %p2894_p13 = scmp.lt.s32.totalorder %s3214_s20, %s2892_s30 }
  0x5c   : > { %2248 = vmatpush3.msra.mxu1 %v268_v6  ;;  %2214 = vmatprep.subr.mxu0 %v286_v7  ;;  %252 = vst [vmem:[#allocation2 + $0x10] sm:$0xff] %v3155_v16  ;;  %v262_v20 = vld [vmem:[#allocation6 + $0x38] sm:$0xff]  ;;  %v261_v22 = vld [vmem:[#allocation6 + $0x30] sm:$0xff]  ;;  %v279_v23 = vld [vmem:[#allocation6 + $0xa8] sm:$0xff]  ;;  %p2890_p12 = pneg %p2889_p7  ;;  %p2895_p10 = scmp.lt.s32.totalorder %s2893_s5, %s2887_s24 }
  0x5d   : > { %2249 = vmatprep.subr.mxu1 %v267_v8  ;;  %2215 = vmatpush3.msra.mxu0 %v286_v7  ;;  %v260_v24 = vld [vmem:[#allocation6 + $0x28] sm:$0xff]  ;;  %v278_v25 = vld [vmem:[#allocation6 + $0xa0] sm:$0xff]  ;;  %v277_v27 = vld [vmem:[#allocation6 + $0x98] sm:$0xff] }
  0x5e   : > { %2250 = vmatpush3.msra.mxu1 %v267_v8  ;;  %2216 = vmatprep.subr.mxu0 %v285_v9  ;;  %v259_v26 = vld [vmem:[#allocation6 + $0x20] sm:$0xff]  ;;  %v258_v28 = vld [vmem:[#allocation6 + $0x18] sm:$0xff]  ;;  %v276_v29 = vld [vmem:[#allocation6 + $0x90] sm:$0xff]  ;;  %p2896_p0 = por %p2895_p10, %p2894_p13 }
  0x5f   : > { %2251 = vmatprep.subr.mxu1 %v266_v10  ;;  %2217 = vmatpush3.msra.mxu0 %v285_v9  ;;  %v257_v30 = vld [vmem:[#allocation6 + $0x10] sm:$0xff]  ;;  %v275_v31 = vld [vmem:[#allocation6 + $0x88] sm:$0xff]  ;;  %v274_v33 = vld [vmem:[#allocation6 + $0x80] sm:$0xff] }
  0x60   : > { %2252 = vmatpush3.msra.mxu1 %v266_v10  ;;  %2218 = vmatprep.subr.mxu0 %v284_v11  ;;  %v256_v32 = vld [vmem:[#allocation6 + $0x8] sm:$0xff]  ;;  %v255_v34 = vld [vmem:[#allocation6] sm:$0xff]  ;;  %v458_v37 = vld [vmem:[#allocation6 + $0x178] sm:$0xff]  ;;  %p2897_p5 = pnand %p2896_p0, %p2890_p12 }
  0x61   : > { %2253 = vmatprep.subr.mxu1 %v265_v12  ;;  %2219 = vmatpush3.msra.mxu0 %v284_v11  ;;  %v457_v39 = vld [vmem:[#allocation6 + $0x170] sm:$0xff]  ;;  %v456_v40 = vld [vmem:[#allocation6 + $0x168] sm:$0xff]  ;;  %v455_v41 = vld [vmem:[#allocation6 + $0x160] sm:$0xff] }
  0x62   : > { %2254 = vmatpush3.msra.mxu1 %v265_v12  ;;  %2220 = vmatprep.subr.mxu0 %v283_v13  ;;  %v253_v35 = vld [vmem:[#allocation2 + $0x7] sm:$0xff]  ;;  %v454_v42 = vld [vmem:[#allocation6 + $0x158] sm:$0xff]  ;;  %v453_v43 = vld [vmem:[#allocation6 + $0x150] sm:$0xff] }
  0x63   : > { %2255 = vmatprep.subr.mxu1 %v264_v14  ;;  %2221 = vmatpush3.msra.mxu0 %v283_v13  ;;  %v254_v36 = vld [vmem:[#allocation2 + $0xf] sm:$0xff]  ;;  %v451_v45 = vld [vmem:[#allocation6 + $0x140] sm:$0xff]  ;;  %v450_v46 = vld [vmem:[#allocation6 + $0x138] sm:$0xff] }
  0x64   : > { %2256 = vmatpush3.msra.mxu1 %v264_v14  ;;  %2222 = vmatprep.subr.mxu0 %v282_v17  ;;  %v440_v38 = vld [vmem:[#allocation2 + $0x9] sm:$0xff]  ;;  %v447_v49 = vld [vmem:[#allocation6 + $0x120] sm:$0xff]  ;;  %v446_v50 = vld [vmem:[#allocation6 + $0x118] sm:$0xff] }
  0x65   : > { %2257 = vmatprep.subr.mxu1 %v263_v18  ;;  %2223 = vmatpush3.msra.mxu0 %v282_v17  ;;  %v452_v44 = vld [vmem:[#allocation6 + $0x148] sm:$0xff]  ;;  %v449_v47 = vld [vmem:[#allocation6 + $0x130] sm:$0xff]  ;;  %v443_v53 = vld [vmem:[#allocation6 + $0x100] sm:$0xff] }
  0x66   : > { %2258 = vmatpush3.msra.mxu1 %v263_v18  ;;  %2224 = vmatprep.subr.mxu0 %v281_v19  ;;  %v448_v48 = vld [vmem:[#allocation6 + $0x128] sm:$0xff]  ;;  %v445_v51 = vld [vmem:[#allocation6 + $0x110] sm:$0xff]  ;;  %v595_v55 = vld [vmem:[#allocation6 + $0x278] sm:$0xff] }
  0x67   : > { %2259 = vmatprep.subr.mxu1 %v262_v20  ;;  %2225 = vmatpush3.msra.mxu0 %v281_v19  ;;  %v444_v52 = vld [vmem:[#allocation6 + $0x108] sm:$0xff]  ;;  %v441_v54 = vld [vmem:[#allocation2 + $0x11] sm:$0xff]  ;;  %v592_v61 = vld [vmem:[#allocation6 + $0x260] sm:$0xff] }
  0x68   : > { %2260 = vmatpush3.msra.mxu1 %v262_v20  ;;  %2226 = vmatprep.subr.mxu0 %v280_v21  ;;  %v576_v56 = vld [vmem:[#allocation6 + $0x1f8] sm:$0xff]  ;;  %v594_v57 = vld [vmem:[#allocation6 + $0x270] sm:$0xff]  ;;  %v593_v59 = vld [vmem:[#allocation6 + $0x268] sm:$0xff] }
  0x69   : > { %2261 = vmatprep.subr.mxu1 %v261_v22  ;;  %2227 = vmatpush3.msra.mxu0 %v280_v21  ;;  %v575_v58 = vld [vmem:[#allocation6 + $0x1f0] sm:$0xff]  ;;  %v574_v60 = vld [vmem:[#allocation6 + $0x1e8] sm:$0xff]  ;;  %v573_v62 = vld [vmem:[#allocation6 + $0x1e0] sm:$0xff] }
  0x6a   : > { %2262 = vmatpush3.msra.mxu1 %v261_v22  ;;  %2228 = vmatprep.subr.mxu0 %v279_v23  ;;  %v591_v63 = vld [vmem:[#allocation6 + $0x258] sm:$0xff]  ;;  %v590_v1 = vld [vmem:[#allocation6 + $0x250] sm:$0xff]  ;;  %v589_v3 = vld [vmem:[#allocation6 + $0x248] sm:$0xff] }
  0x6b   : > { %2263 = vmatprep.subr.mxu1 %v260_v24  ;;  %2229 = vmatpush3.msra.mxu0 %v279_v23  ;;  %v572_v0 = vld [vmem:[#allocation6 + $0x1d8] sm:$0xff]  ;;  %v571_v2 = vld [vmem:[#allocation6 + $0x1d0] sm:$0xff]  ;;  %v588_v4 = vld [vmem:[#allocation6 + $0x240] sm:$0xff] }
  0x6c   : > { %2264 = vmatpush3.msra.mxu1 %v260_v24  ;;  %2230 = vmatprep.subr.mxu0 %v278_v25  ;;  %v587_v5 = vld [vmem:[#allocation6 + $0x238] sm:$0xff]  ;;  %v586_v6 = vld [vmem:[#allocation6 + $0x230] sm:$0xff]  ;;  %v585_v7 = vld [vmem:[#allocation6 + $0x228] sm:$0xff] }
  0x6d   : > { %2265 = vmatprep.subr.mxu1 %v259_v26  ;;  %2231 = vmatpush3.msra.mxu0 %v278_v25  ;;  %v570_v8 = vld [vmem:[#allocation6 + $0x1c8] sm:$0xff]  ;;  %v584_v9 = vld [vmem:[#allocation6 + $0x220] sm:$0xff]  ;;  %v583_v11 = vld [vmem:[#allocation6 + $0x218] sm:$0xff] }
  0x6e   : > { %2266 = vmatpush3.msra.mxu1 %v259_v26  ;;  %2232 = vmatprep.subr.mxu0 %v277_v27  ;;  %v569_v10 = vld [vmem:[#allocation6 + $0x1c0] sm:$0xff]  ;;  %v568_v12 = vld [vmem:[#allocation6 + $0x1b8] sm:$0xff]  ;;  %v582_v13 = vld [vmem:[#allocation6 + $0x210] sm:$0xff] }
  0x6f   : > { %2267 = vmatprep.subr.mxu1 %v258_v28  ;;  %2233 = vmatpush3.msra.mxu0 %v277_v27  ;;  %v567_v14 = vld [vmem:[#allocation6 + $0x1b0] sm:$0xff]  ;;  %v581_v17 = vld [vmem:[#allocation6 + $0x208] sm:$0xff]  ;;  %v580_v19 = vld [vmem:[#allocation6 + $0x200] sm:$0xff] }
  0x70   : > { %2268 = vmatpush3.msra.mxu1 %v258_v28  ;;  %2234 = vmatprep.subr.mxu0 %v276_v29  ;;  %v566_v18 = vld [vmem:[#allocation6 + $0x1a8] sm:$0xff]  ;;  %v565_v20 = vld [vmem:[#allocation6 + $0x1a0] sm:$0xff]  ;;  %v764_v21 = vld [vmem:[#allocation6 + $0x2f8] sm:$0xff] }
  0x71   : > { %2269 = vmatprep.subr.mxu1 %v257_v30  ;;  %2235 = vmatpush3.msra.mxu0 %v276_v29  ;;  %v564_v22 = vld [vmem:[#allocation6 + $0x198] sm:$0xff]  ;;  %v563_v23 = vld [vmem:[#allocation6 + $0x190] sm:$0xff]  ;;  %v562_v24 = vld [vmem:[#allocation6 + $0x188] sm:$0xff] }
  0x72   : > { %2270 = vmatpush3.msra.mxu1 %v257_v30  ;;  %2236 = vmatprep.subr.mxu0 %v275_v31  ;;  %v561_v25 = vld [vmem:[#allocation6 + $0x180] sm:$0xff] }
  0x73   : > { %2271 = vmatprep.subr.mxu1 %v256_v32  ;;  %2237 = vmatpush3.msra.mxu0 %v275_v31 }
  0x74   : > { %2272 = vmatpush3.msra.mxu1 %v256_v32  ;;  %2238 = vmatprep.subr.mxu0 %v274_v33  ;;  %v1917_v32 = vld [vmem:[#allocation8] ss:$0 sm:$0xff] }
  0x75   : > { %2273 = vmatprep.subr.mxu1 %v255_v34  ;;  %2239 = vmatpush3.msra.mxu0 %v274_v33 }
  0x76   : > { %2240 = vmatprep.mubr.f32.mxu0 %v3151_v15  ;;  %2274 = vmatpush3.msra.mxu1 %v255_v34 }
  0x77   : > { %2275 = vmatprep.mubr.f32.mxu1 %v253_v35  ;;  %2241 = vmatmul.mubr.f32.vlgmr.msra.gmra.mxu0 %v3155_v16  ;;  %v1918_v35 = vld [vmem:[%s3261_s3] ss:$0 sm:$0xff] }
  0x78   : > { %2276 = vmatmul.mubr.f32.vlgmr.msra.gmra.mxu1 %v254_v36  ;;  %2278 = vmatprep.subr.mxu0 %v458_v37 }
  0x79   : > { %2310 = vmatprep.mubr.f32.mxu0 %v440_v38  ;;  %2279 = vmatpush3.msra.mxu0 %v458_v37 }
  0x7a   : > { %2280 = vmatprep.subr.mxu0 %v457_v39  ;;  %2313 = vmatprep.subr.mxu1 %v595_v55 }
  0x7b   : > { %2281 = vmatpush3.msra.mxu0 %v457_v39  ;;  %2314 = vmatpush3.msra.mxu1 %v595_v55  ;;  %v755_v55 = vld [vmem:[#allocation6 + $0x2b0] sm:$0xff] }
  0x7c   : > { %2282 = vmatprep.subr.mxu0 %v456_v40  ;;  %2315 = vmatprep.subr.mxu1 %v594_v57 }
  0x7d   : > { %2283 = vmatpush3.msra.mxu0 %v456_v40  ;;  %2316 = vmatpush3.msra.mxu1 %v594_v57  ;;  %v753_v57 = vld [vmem:[#allocation6 + $0x2a0] sm:$0xff] }
  0x7e   : > { %2284 = vmatprep.subr.mxu0 %v455_v41  ;;  %2317 = vmatprep.subr.mxu1 %v593_v59 }
  0x7f   : > { %2285 = vmatpush3.msra.mxu0 %v455_v41  ;;  %2318 = vmatpush3.msra.mxu1 %v593_v59  ;;  %v751_v59 = vld [vmem:[#allocation6 + $0x290] sm:$0xff] }
  0x80   : > { %2286 = vmatprep.subr.mxu0 %v454_v42  ;;  %2319 = vmatprep.subr.mxu1 %v592_v61 }
  0x81   : > { %2287 = vmatpush3.msra.mxu0 %v454_v42  ;;  %2320 = vmatpush3.msra.mxu1 %v592_v61  ;;  %v749_v61 = vld [vmem:[#allocation6 + $0x280] sm:$0xff] }
  0x82   : > { %2288 = vmatprep.subr.mxu0 %v453_v43  ;;  %2321 = vmatprep.subr.mxu1 %v591_v63 }
  0x83   : > { %2289 = vmatpush3.msra.mxu0 %v453_v43  ;;  %2322 = vmatpush3.msra.mxu1 %v591_v63  ;;  %v905_v63 = vld [vmem:[#allocation6 + $0x3f8] sm:$0xff] }
  0x84   : > { %2290 = vmatprep.subr.mxu0 %v452_v44  ;;  %2323 = vmatprep.subr.mxu1 %v590_v1 }
  0x85   : > { %2291 = vmatpush3.msra.mxu0 %v452_v44  ;;  %2324 = vmatpush3.msra.mxu1 %v590_v1  ;;  %v763_v44 = vld [vmem:[#allocation6 + $0x2f0] sm:$0xff] }
  0x86   : > { %2292 = vmatprep.subr.mxu0 %v451_v45  ;;  %2325 = vmatprep.subr.mxu1 %v589_v3  ;;  %v904_v1 = vld [vmem:[#allocation6 + $0x3f0] sm:$0xff] }
  0x87   : > { %2293 = vmatpush3.msra.mxu0 %v451_v45  ;;  %2326 = vmatpush3.msra.mxu1 %v589_v3  ;;  %v762_v45 = vld [vmem:[#allocation6 + $0x2e8] sm:$0xff] }
  0x88   : > { %2294 = vmatprep.subr.mxu0 %v450_v46  ;;  %2327 = vmatprep.subr.mxu1 %v588_v4  ;;  %v903_v3 = vld [vmem:[#allocation6 + $0x3e8] sm:$0xff] }
  0x89   : > { %2295 = vmatpush3.msra.mxu0 %v450_v46  ;;  %2328 = vmatpush3.msra.mxu1 %v588_v4  ;;  %v761_v46 = vld [vmem:[#allocation6 + $0x2e0] sm:$0xff]  ;;  %v884_v4 = vld [vmem:[#allocation6 + $0x368] sm:$0xff] }
  0x8a   : > { %2296 = vmatprep.subr.mxu0 %v449_v47  ;;  %2329 = vmatprep.subr.mxu1 %v587_v5 }
  0x8b   : > { %2297 = vmatpush3.msra.mxu0 %v449_v47  ;;  %2330 = vmatpush3.msra.mxu1 %v587_v5  ;;  %v760_v47 = vld [vmem:[#allocation6 + $0x2d8] sm:$0xff]  ;;  %v902_v5 = vld [vmem:[#allocation6 + $0x3e0] sm:$0xff] }
  0x8c   : > { %2298 = vmatprep.subr.mxu0 %v448_v48  ;;  %2331 = vmatprep.subr.mxu1 %v586_v6 }
  0x8d   : > { %2299 = vmatpush3.msra.mxu0 %v448_v48  ;;  %2332 = vmatpush3.msra.mxu1 %v586_v6  ;;  %v883_v6 = vld [vmem:[#allocation6 + $0x360] sm:$0xff] }
  0x8e   : > { %2300 = vmatprep.subr.mxu0 %v447_v49  ;;  %2333 = vmatprep.subr.mxu1 %v585_v7 }
  0x8f   : > { %2301 = vmatpush3.msra.mxu0 %v447_v49  ;;  %2334 = vmatpush3.msra.mxu1 %v585_v7  ;;  %v901_v7 = vld [vmem:[#allocation6 + $0x3d8] sm:$0xff] }
  0x90   : > { %2302 = vmatprep.subr.mxu0 %v446_v50  ;;  %2335 = vmatprep.subr.mxu1 %v584_v9 }
  0x91   : > { %2303 = vmatpush3.msra.mxu0 %v446_v50  ;;  %2336 = vmatpush3.msra.mxu1 %v584_v9  ;;  %v900_v9 = vld [vmem:[#allocation6 + $0x3d0] sm:$0xff] }
  0x92   : > { %2304 = vmatprep.subr.mxu0 %v445_v51  ;;  %2337 = vmatprep.subr.mxu1 %v583_v11 }
  0x93   : > { %2305 = vmatpush3.msra.mxu0 %v445_v51  ;;  %2338 = vmatpush3.msra.mxu1 %v583_v11  ;;  %v759_v51 = vld [vmem:[#allocation6 + $0x2d0] sm:$0xff]  ;;  %v898_v11 = vld [vmem:[#allocation6 + $0x3c0] sm:$0xff] }
  0x94   : > { %2306 = vmatprep.subr.mxu0 %v444_v52  ;;  %2339 = vmatprep.subr.mxu1 %v582_v13 }
  0x95   : > { %2307 = vmatpush3.msra.mxu0 %v444_v52  ;;  %2340 = vmatpush3.msra.mxu1 %v582_v13  ;;  %v758_v52 = vld [vmem:[#allocation6 + $0x2c8] sm:$0xff]  ;;  %v896_v13 = vld [vmem:[#allocation6 + $0x3b0] sm:$0xff] }
  0x96   : > { %2308 = vmatprep.subr.mxu0 %v443_v53  ;;  %2341 = vmatprep.subr.mxu1 %v581_v17 }
  0x97   : > { %2309 = vmatpush3.msra.mxu0 %v443_v53  ;;  %2342 = vmatpush3.msra.mxu1 %v581_v17  ;;  %v757_v53 = vld [vmem:[#allocation6 + $0x2c0] sm:$0xff]  ;;  %v895_v17 = vld [vmem:[#allocation6 + $0x3a8] sm:$0xff] }
  0x98   : > { %2311 = vmatmul.mubr.f32.vlgmr.msra.gmra.mxu0 %v441_v54  ;;  %2348 = vmatprep.subr.mxu0 %v576_v56  ;;  %v756_v54 = vld [vmem:[#allocation6 + $0x2b8] sm:$0xff] }
  0x99   : > { %2349 = vmatpush3.msra.mxu0 %v576_v56  ;;  %2343 = vmatprep.subr.mxu1 %v580_v19  ;;  %v754_v56 = vld [vmem:[#allocation6 + $0x2a8] sm:$0xff] }
  0x9a   : > { %2350 = vmatprep.subr.mxu0 %v575_v58  ;;  %2344 = vmatpush3.msra.mxu1 %v580_v19  ;;  %v894_v19 = vld [vmem:[#allocation6 + $0x3a0] sm:$0xff] }
  0x9b   : > { %2351 = vmatpush3.msra.mxu0 %v575_v58  ;;  %2383 = vmatprep.subr.mxu1 %v764_v21  ;;  %v752_v58 = vld [vmem:[#allocation6 + $0x298] sm:$0xff] }
  0x9c   : > { %2352 = vmatprep.subr.mxu0 %v574_v60 }
  0x9d   : > { %2353 = vmatpush3.msra.mxu0 %v574_v60  ;;  %v750_v60 = vld [vmem:[#allocation6 + $0x288] sm:$0xff] }
  0x9e   : > { %2354 = vmatprep.subr.mxu0 %v573_v62 }
  0x9f   : > { %2355 = vmatpush3.msra.mxu0 %v573_v62 }
  0xa0   : > { %2356 = vmatprep.subr.mxu0 %v572_v0 }
  0xa1   : > { %2357 = vmatpush3.msra.mxu0 %v572_v0  ;;  %v886_v0 = vld [vmem:[#allocation6 + $0x378] sm:$0xff] }
  0xa2   : > { %2358 = vmatprep.subr.mxu0 %v571_v2 }
  0xa3   : > { %2359 = vmatpush3.msra.mxu0 %v571_v2  ;;  %v885_v2 = vld [vmem:[#allocation6 + $0x370] sm:$0xff] }
  0xa4   : > { %2360 = vmatprep.subr.mxu0 %v570_v8 }
  0xa5   : > { %2361 = vmatpush3.msra.mxu0 %v570_v8  ;;  %v882_v8 = vld [vmem:[#allocation6 + $0x358] sm:$0xff] }
  0xa6   : > { %2362 = vmatprep.subr.mxu0 %v569_v10 }
  0xa7   : > { %2363 = vmatpush3.msra.mxu0 %v569_v10  ;;  %v899_v10 = vld [vmem:[#allocation6 + $0x3c8] sm:$0xff] }
  0xa8   : > { %2364 = vmatprep.subr.mxu0 %v568_v12 }
  0xa9   : > { %2365 = vmatpush3.msra.mxu0 %v568_v12  ;;  %v897_v12 = vld [vmem:[#allocation6 + $0x3b8] sm:$0xff] }
  0xaa   : > { %2366 = vmatprep.subr.mxu0 %v567_v14 }
  0xab   : > { %2367 = vmatpush3.msra.mxu0 %v567_v14  ;;  %v881_v14 = vld [vmem:[#allocation6 + $0x350] sm:$0xff] }
  0xac   : > { %2368 = vmatprep.subr.mxu0 %v566_v18 }
  0xad   : > { %2369 = vmatpush3.msra.mxu0 %v566_v18  ;;  %v880_v18 = vld [vmem:[#allocation6 + $0x348] sm:$0xff] }
  0xae   : > { %2370 = vmatprep.subr.mxu0 %v565_v20 }
  0xaf   : > { %2371 = vmatpush3.msra.mxu0 %v565_v20  ;;  %v879_v20 = vld [vmem:[#allocation6 + $0x340] sm:$0xff] }
  0xb0   : > { %2372 = vmatprep.subr.mxu0 %v564_v22 }
  0xb1   : > { %2373 = vmatpush3.msra.mxu0 %v564_v22  ;;  %v878_v22 = vld [vmem:[#allocation6 + $0x338] sm:$0xff] }
  0xb2   : > { %2374 = vmatprep.subr.mxu0 %v563_v23 }
  0xb3   : > { %2375 = vmatpush3.msra.mxu0 %v563_v23  ;;  %v892_v23 = vld [vmem:[#allocation6 + $0x390] sm:$0xff] }
  0xb4   : > { %2376 = vmatprep.subr.mxu0 %v562_v24 }
  0xb5   : > { %2377 = vmatpush3.msra.mxu0 %v562_v24  ;;  %v877_v24 = vld [vmem:[#allocation6 + $0x330] sm:$0xff] }
  0xb6   : > { %2378 = vmatprep.subr.mxu0 %v561_v25 }
  0xb7   : > { %2379 = vmatpush3.msra.mxu0 %v561_v25  ;;  %v891_v25 = vld [vmem:[#allocation6 + $0x388] sm:$0xff] }
  0xb8   : > { %2418 = vmatprep.subr.mxu0 %v905_v63 }
 0x137   : > { %v2242_v26 = vpop.f32.mrf.mxu0 }
 0x138   : > { %v2277_v27 = vpop.f32.mrf.mxu1 }
 0x139   : > { %v356_v28 = vpop.f32.mrf.mxu0  ;;  %v437_v30 = vadd.f32 %v2277_v27, %v2242_v26  ;;  %v876_v26 = vld [vmem:[#allocation6 + $0x328] sm:$0xff]  ;;  %v890_v27 = vld [vmem:[#allocation6 + $0x380] sm:$0xff] }
 0x13a   : > { %v431_v29 = vpop.f32.mrf.mxu1 }
 0x13b   : > { %v432_v33 = vadd.f32 %v431_v29, %v356_v28  ;;  %v875_v28 = vld [vmem:[#allocation6 + $0x320] sm:$0xff]  ;;  %v1074_v29 = vld [vmem:[#allocation6 + $0x478] sm:$0xff] }
 0x158   : > { %v2312_v31 = vpop.f32.mrf.mxu0 }
 0x159   : > { %v535_v34 = vadd.f32 %v2312_v31, %v437_v30  ;;  %v874_v30 = vld [vmem:[#allocation6 + $0x318] sm:$0xff]  ;;  %v873_v31 = vld [vmem:[#allocation6 + $0x310] sm:$0xff] }
 0x15a   : > { %v525_v36 = vpop.f32.mrf.mxu0 }
 0x15b   : > { %v544_v37 = vmul.f32 %v1917_v32, %v535_v34  ;;  %v534_v38 = vadd.f32 %v525_v36, %v432_v33  ;;  %v871_v33 = vld [vmem:[#allocation6 + $0x300] sm:$0xff] }
 0x15d   : > { %v553_v39 = vadd.f32 %v1918_v35, %v544_v37  ;;  %v543_v40 = vmul.f32 %v1917_v32, %v534_v38  ;;  %v872_v32 = vld [vmem:[#allocation6 + $0x308] sm:$0xff] }
 0x15f   : > { %v3163_v41 = vmax.f32 %v553_v39, 0.0  ;;  %v552_v42 = vadd.f32 %v1918_v35, %v543_v40  ;;  %v1919_v40 = vld [vmem:[#allocation8 + $0x1] ss:$0 sm:$0xff] }
 0x161   : > { %557 = vst [vmem:[#allocation2 + $0x10] sm:$0xff] %v3163_v41  ;;  %v3166_v43 = vmax.f32 %v552_v42, 0.0 }
 0x163   : > { %556 = vst [vmem:[#allocation2 + $0x8] sm:$0xff] %v3166_v43  ;;  %2345 = vmatprep.mubr.f32.mxu1 %v3166_v43 }
 0x164   : > { %2346 = vmatmul.mubr.f32.vlgmr.msra.gmra.mxu1 %v3163_v41 }
 0x165   : > { %2384 = vmatpush3.msra.mxu1 %v764_v21  ;;  %v893_v21 = vld [vmem:[#allocation6 + $0x398] sm:$0xff] }
 0x166   : > { %2385 = vmatprep.subr.mxu1 %v763_v44 }
 0x167   : > { %2386 = vmatpush3.msra.mxu1 %v763_v44 }
 0x168   : > { %2387 = vmatprep.subr.mxu1 %v762_v45  ;;  %v747_v62 = vld [vmem:[#allocation2 + $0x12] sm:$0xff] }
 0x169   : > { %2388 = vmatpush3.msra.mxu1 %v762_v45  ;;  %v1921_v45 = vld [vmem:[%s3261_s3 + $0x1] ss:$0 sm:$0xff] }
 0x16a   : > { %v558_v48 = vld [vmem:[#allocation2 + $0x6] sm:$0xff]  ;;  %v559_v49 = vld [vmem:[#allocation2 + $0xe] sm:$0xff]  ;;  %2389 = vmatprep.subr.mxu1 %v761_v46 }
 0x16b   : > { %v746_v50 = vld [vmem:[#allocation2 + $0xa] sm:$0xff]  ;;  %2380 = vmatprep.mubr.f32.mxu0 %v558_v48  ;;  %2390 = vmatpush3.msra.mxu1 %v761_v46 }
 0x16c   : > { %2415 = vmatprep.mubr.f32.mxu1 %v746_v50  ;;  %2381 = vmatmul.mubr.f32.vlgmr.msra.gmra.mxu0 %v559_v49 }
 0x16d   : > { %2391 = vmatprep.subr.mxu1 %v760_v47  ;;  %2419 = vmatpush3.msra.mxu0 %v905_v63  ;;  %v1067_v63 = vld [vmem:[#allocation6 + $0x440] sm:$0xff] }
 0x16e   : > { %2392 = vmatpush3.msra.mxu1 %v760_v47  ;;  %2420 = vmatprep.subr.mxu0 %v904_v1 }
 0x16f   : > { %2393 = vmatprep.subr.mxu1 %v759_v51  ;;  %2421 = vmatpush3.msra.mxu0 %v904_v1  ;;  %v1065_v1 = vld [vmem:[#allocation6 + $0x430] sm:$0xff] }
 0x170   : > { %2394 = vmatpush3.msra.mxu1 %v759_v51  ;;  %2422 = vmatprep.subr.mxu0 %v903_v3 }
 0x171   : > { %2395 = vmatprep.subr.mxu1 %v758_v52  ;;  %2423 = vmatpush3.msra.mxu0 %v903_v3  ;;  %v1063_v3 = vld [vmem:[#allocation6 + $0x420] sm:$0xff] }
 0x172   : > { %2396 = vmatpush3.msra.mxu1 %v758_v52  ;;  %2424 = vmatprep.subr.mxu0 %v902_v5 }
 0x173   : > { %2397 = vmatprep.subr.mxu1 %v757_v53  ;;  %2425 = vmatpush3.msra.mxu0 %v902_v5  ;;  %v1061_v5 = vld [vmem:[#allocation6 + $0x410] sm:$0xff] }
 0x174   : > { %2398 = vmatpush3.msra.mxu1 %v757_v53  ;;  %2426 = vmatprep.subr.mxu0 %v901_v7 }
 0x175   : > { %2399 = vmatprep.subr.mxu1 %v756_v54  ;;  %2427 = vmatpush3.msra.mxu0 %v901_v7  ;;  %v1059_v7 = vld [vmem:[#allocation6 + $0x400] sm:$0xff] }
 0x176   : > { %2400 = vmatpush3.msra.mxu1 %v756_v54  ;;  %2428 = vmatprep.subr.mxu0 %v900_v9 }
 0x177   : > { %2401 = vmatprep.subr.mxu1 %v755_v55  ;;  %2429 = vmatpush3.msra.mxu0 %v900_v9  ;;  %v1215_v9 = vld [vmem:[#allocation6 + $0x578] sm:$0xff] }
 0x178   : > { %2402 = vmatpush3.msra.mxu1 %v755_v55  ;;  %2430 = vmatprep.subr.mxu0 %v899_v10 }
 0x179   : > { %2403 = vmatprep.subr.mxu1 %v754_v56  ;;  %2431 = vmatpush3.msra.mxu0 %v899_v10  ;;  %v1196_v10 = vld [vmem:[#allocation6 + $0x4f8] sm:$0xff] }
 0x17a   : > { %2404 = vmatpush3.msra.mxu1 %v754_v56  ;;  %2432 = vmatprep.subr.mxu0 %v898_v11  ;;  %v1073_v56 = vld [vmem:[#allocation6 + $0x470] sm:$0xff] }
 0x17b   : > { %2405 = vmatprep.subr.mxu1 %v753_v57  ;;  %2433 = vmatpush3.msra.mxu0 %v898_v11  ;;  %v1214_v11 = vld [vmem:[#allocation6 + $0x570] sm:$0xff] }
 0x17c   : > { %2406 = vmatpush3.msra.mxu1 %v753_v57  ;;  %2434 = vmatprep.subr.mxu0 %v897_v12  ;;  %v1072_v57 = vld [vmem:[#allocation6 + $0x468] sm:$0xff] }
 0x17d   : > { %2407 = vmatprep.subr.mxu1 %v752_v58  ;;  %2435 = vmatpush3.msra.mxu0 %v897_v12  ;;  %v1195_v12 = vld [vmem:[#allocation6 + $0x4f0] sm:$0xff] }
 0x17e   : > { %2408 = vmatpush3.msra.mxu1 %v752_v58  ;;  %2436 = vmatprep.subr.mxu0 %v896_v13  ;;  %v1071_v58 = vld [vmem:[#allocation6 + $0x460] sm:$0xff] }
 0x17f   : > { %2409 = vmatprep.subr.mxu1 %v751_v59  ;;  %2437 = vmatpush3.msra.mxu0 %v896_v13  ;;  %v1213_v13 = vld [vmem:[#allocation6 + $0x568] sm:$0xff] }
 0x180   : > { %2410 = vmatpush3.msra.mxu1 %v751_v59  ;;  %2438 = vmatprep.subr.mxu0 %v895_v17 }
 0x181   : > { %2411 = vmatprep.subr.mxu1 %v750_v60  ;;  %2439 = vmatpush3.msra.mxu0 %v895_v17  ;;  %v1212_v17 = vld [vmem:[#allocation6 + $0x560] sm:$0xff] }
 0x182   : > { %2412 = vmatpush3.msra.mxu1 %v750_v60  ;;  %2440 = vmatprep.subr.mxu0 %v894_v19 }
 0x183   : > { %2413 = vmatprep.subr.mxu1 %v749_v61  ;;  %2441 = vmatpush3.msra.mxu0 %v894_v19  ;;  %v1211_v19 = vld [vmem:[#allocation6 + $0x558] sm:$0xff] }
 0x184   : > { %2414 = vmatpush3.msra.mxu1 %v749_v61  ;;  %2442 = vmatprep.subr.mxu0 %v893_v21 }
 0x185   : > { %2416 = vmatmul.mubr.f32.vlgmr.msra.gmra.mxu1 %v747_v62  ;;  %2453 = vmatprep.subr.mxu1 %v886_v0  ;;  %v1068_v62 = vld [vmem:[#allocation6 + $0x448] sm:$0xff] }
 0x186   : > { %2454 = vmatpush3.msra.mxu1 %v886_v0  ;;  %2443 = vmatpush3.msra.mxu0 %v893_v21  ;;  %v1066_v0 = vld [vmem:[#allocation6 + $0x438] sm:$0xff]  ;;  %v1210_v21 = vld [vmem:[#allocation6 + $0x550] sm:$0xff] }
 0x187   : > { %2455 = vmatprep.subr.mxu1 %v885_v2  ;;  %2444 = vmatprep.subr.mxu0 %v892_v23 }
 0x188   : > { %2456 = vmatpush3.msra.mxu1 %v885_v2  ;;  %2445 = vmatpush3.msra.mxu0 %v892_v23  ;;  %v1064_v2 = vld [vmem:[#allocation6 + $0x428] sm:$0xff]  ;;  %v1208_v23 = vld [vmem:[#allocation6 + $0x540] sm:$0xff] }
 0x189   : > { %2457 = vmatprep.subr.mxu1 %v884_v4  ;;  %2446 = vmatprep.subr.mxu0 %v891_v25 }
 0x18a   : > { %2458 = vmatpush3.msra.mxu1 %v884_v4  ;;  %2447 = vmatpush3.msra.mxu0 %v891_v25  ;;  %v1062_v4 = vld [vmem:[#allocation6 + $0x418] sm:$0xff]  ;;  %v1206_v25 = vld [vmem:[#allocation6 + $0x530] sm:$0xff] }
 0x18b   : > { %2459 = vmatprep.subr.mxu1 %v883_v6  ;;  %2448 = vmatprep.subr.mxu0 %v890_v27 }
 0x18c   : > { %2460 = vmatpush3.msra.mxu1 %v883_v6  ;;  %2449 = vmatpush3.msra.mxu0 %v890_v27  ;;  %v1060_v6 = vld [vmem:[#allocation6 + $0x408] sm:$0xff] }
 0x18d   : > { %2461 = vmatprep.subr.mxu1 %v882_v8  ;;  %2488 = vmatprep.subr.mxu0 %v1074_v29  ;;  %v1205_v27 = vld [vmem:[#allocation6 + $0x528] sm:$0xff] }
 0x18e   : > { %2462 = vmatpush3.msra.mxu1 %v882_v8 }
 0x18f   : > { %2463 = vmatprep.subr.mxu1 %v881_v14 }
 0x190   : > { %2464 = vmatpush3.msra.mxu1 %v881_v14  ;;  %v1194_v14 = vld [vmem:[#allocation6 + $0x4e8] sm:$0xff] }
 0x191   : > { %2465 = vmatprep.subr.mxu1 %v880_v18 }
 0x192   : > { %2466 = vmatpush3.msra.mxu1 %v880_v18  ;;  %v1193_v18 = vld [vmem:[#allocation6 + $0x4e0] sm:$0xff] }
 0x193   : > { %2467 = vmatprep.subr.mxu1 %v879_v20 }
 0x194   : > { %2468 = vmatpush3.msra.mxu1 %v879_v20  ;;  %v1192_v20 = vld [vmem:[#allocation6 + $0x4d8] sm:$0xff] }
 0x195   : > { %2469 = vmatprep.subr.mxu1 %v878_v22 }
 0x196   : > { %2470 = vmatpush3.msra.mxu1 %v878_v22  ;;  %v1209_v22 = vld [vmem:[#allocation6 + $0x548] sm:$0xff] }
 0x197   : > { %2471 = vmatprep.subr.mxu1 %v877_v24 }
 0x198   : > { %2472 = vmatpush3.msra.mxu1 %v877_v24  ;;  %v1207_v24 = vld [vmem:[#allocation6 + $0x538] sm:$0xff] }
 0x199   : > { %2473 = vmatprep.subr.mxu1 %v876_v26 }
 0x19a   : > { %2474 = vmatpush3.msra.mxu1 %v876_v26  ;;  %v1191_v26 = vld [vmem:[#allocation6 + $0x4d0] sm:$0xff] }
 0x19b   : > { %2475 = vmatprep.subr.mxu1 %v875_v28 }
 0x19c   : > { %2476 = vmatpush3.msra.mxu1 %v875_v28  ;;  %v1190_v28 = vld [vmem:[#allocation6 + $0x4c8] sm:$0xff] }
 0x19d   : > { %2477 = vmatprep.subr.mxu1 %v874_v30 }
 0x19e   : > { %2478 = vmatpush3.msra.mxu1 %v874_v30  ;;  %v1189_v30 = vld [vmem:[#allocation6 + $0x4c0] sm:$0xff] }
 0x19f   : > { %2479 = vmatprep.subr.mxu1 %v873_v31 }
 0x1a0   : > { %2480 = vmatpush3.msra.mxu1 %v873_v31  ;;  %v1203_v31 = vld [vmem:[#allocation6 + $0x518] sm:$0xff] }
 0x1a1   : > { %2481 = vmatprep.subr.mxu1 %v872_v32 }
 0x1a2   : > { %2482 = vmatpush3.msra.mxu1 %v872_v32  ;;  %v1188_v32 = vld [vmem:[#allocation6 + $0x4b8] sm:$0xff] }
 0x1a3   : > { %2483 = vmatprep.subr.mxu1 %v871_v33 }
 0x1a4   : > { %2484 = vmatpush3.msra.mxu1 %v871_v33  ;;  %v1202_v33 = vld [vmem:[#allocation6 + $0x510] sm:$0xff] }
 0x1a5   : > { %2523 = vmatprep.subr.mxu1 %v1215_v9 }
 0x224   : > { %v2347_v34 = vpop.f32.mrf.mxu1 }
 0x226   : > { %v662_v36 = vpop.f32.mrf.mxu1 }
 0x22c   : > { %v2382_v35 = vpop.f32.mrf.mxu0 }
 0x22d   : > { %v743_v38 = vadd.f32 %v2382_v35, %v2347_v34  ;;  %v1187_v34 = vld [vmem:[#allocation6 + $0x4b0] sm:$0xff]  ;;  %v1201_v35 = vld [vmem:[#allocation6 + $0x508] sm:$0xff] }
 0x22e   : > { %v737_v37 = vpop.f32.mrf.mxu0 }
 0x22f   : > { %v738_v42 = vadd.f32 %v737_v37, %v662_v36  ;;  %v1186_v36 = vld [vmem:[#allocation6 + $0x4a8] sm:$0xff]  ;;  %v1200_v37 = vld [vmem:[#allocation6 + $0x500] sm:$0xff] }
 0x245   : > { %v2417_v39 = vpop.f32.mrf.mxu1 }
 0x246   : > { %v841_v44 = vadd.f32 %v2417_v39, %v743_v38  ;;  %v1185_v38 = vld [vmem:[#allocation6 + $0x4a0] sm:$0xff]  ;;  %v1384_v39 = vld [vmem:[#allocation6 + $0x5f8] sm:$0xff] }
 0x247   : > { %v831_v46 = vpop.f32.mrf.mxu1 }
 0x248   : > { %v851_v47 = vmul.f32 %v1919_v40, %v841_v44  ;;  %v840_v48 = vadd.f32 %v831_v46, %v738_v42  ;;  %v1183_v42 = vld [vmem:[#allocation6 + $0x490] sm:$0xff]  ;;  %v1182_v44 = vld [vmem:[#allocation6 + $0x488] sm:$0xff] }
 0x24a   : > { %v861_v49 = vadd.f32 %v1921_v45, %v851_v47  ;;  %v850_v50 = vmul.f32 %v1919_v40, %v840_v48  ;;  %v1184_v40 = vld [vmem:[#allocation6 + $0x498] sm:$0xff] }
 0x24c   : > { %v863_v51 = vmax.f32 %v861_v49, 0.0  ;;  %v860_v52 = vadd.f32 %v1921_v45, %v850_v50  ;;  %v1181_v45 = vld [vmem:[#allocation6 + $0x480] sm:$0xff] }
 0x24e   : > { %v3175_v53 = vadd.f32 %v863_v51, %v3155_v16  ;;  %v862_v54 = vmax.f32 %v860_v52, 0.0  ;;  %v1070_v16 = vld [vmem:[#allocation6 + $0x458] sm:$0xff]  ;;  %v1922_v52 = vld [vmem:[#allocation8 + $0x2] ss:$0 sm:$0xff] }
 0x250   : > { %867 = vst [vmem:[#allocation2 + $0x10] sm:$0xff] %v3175_v53  ;;  %v3179_v55 = vadd.f32 %v862_v54, %v3151_v15  ;;  %v1069_v15 = vld [vmem:[#allocation6 + $0x450] sm:$0xff] }
 0x252   : > { %866 = vst [vmem:[#allocation2 + $0x8] sm:$0xff] %v3179_v55  ;;  %2450 = vmatprep.mubr.f32.mxu0 %v3179_v55 }
 0x253   : > { %2451 = vmatmul.mubr.f32.vlgmr.msra.gmra.mxu0 %v3175_v53 }
 0x254   : > { %2489 = vmatpush3.msra.mxu0 %v1074_v29  ;;  %v1204_v29 = vld [vmem:[#allocation6 + $0x520] sm:$0xff] }
 0x255   : > { %2490 = vmatprep.subr.mxu0 %v1073_v56 }
 0x256   : > { %2491 = vmatpush3.msra.mxu0 %v1073_v56 }
 0x257   : > { %2492 = vmatprep.subr.mxu0 %v1072_v57  ;;  %v1057_v8 = vld [vmem:[#allocation2 + $0x11] sm:$0xff] }
 0x258   : > { %2493 = vmatpush3.msra.mxu0 %v1072_v57  ;;  %v1924_v57 = vld [vmem:[%s3261_s3 + $0x2] ss:$0 sm:$0xff] }
 0x259   : > { %v868_v59 = vld [vmem:[#allocation2 + $0x7] sm:$0xff]  ;;  %v869_v60 = vld [vmem:[#allocation2 + $0xf] sm:$0xff]  ;;  %2494 = vmatprep.subr.mxu0 %v1071_v58 }
 0x25a   : > { %v1056_v61 = vld [vmem:[#allocation2 + $0x9] sm:$0xff]  ;;  %2485 = vmatprep.mubr.f32.mxu1 %v868_v59  ;;  %2495 = vmatpush3.msra.mxu0 %v1071_v58 }
 0x25b   : > { %2520 = vmatprep.mubr.f32.mxu0 %v1056_v61  ;;  %2486 = vmatmul.mubr.f32.vlgmr.msra.gmra.mxu1 %v869_v60 }
 0x25c   : > { %2496 = vmatprep.subr.mxu0 %v1070_v16  ;;  %2524 = vmatpush3.msra.mxu1 %v1215_v9  ;;  %v1376_v9 = vld [vmem:[#allocation6 + $0x5b8] sm:$0xff] }
 0x25d   : > { %2497 = vmatpush3.msra.mxu0 %v1070_v16  ;;  %2525 = vmatprep.subr.mxu1 %v1214_v11 }
 0x25e   : > { %2498 = vmatprep.subr.mxu0 %v1069_v15  ;;  %2526 = vmatpush3.msra.mxu1 %v1214_v11  ;;  %v1374_v11 = vld [vmem:[#allocation6 + $0x5a8] sm:$0xff] }
 0x25f   : > { %2499 = vmatpush3.msra.mxu0 %v1069_v15  ;;  %2527 = vmatprep.subr.mxu1 %v1213_v13 }
 0x260   : > { %2500 = vmatprep.subr.mxu0 %v1068_v62  ;;  %2528 = vmatpush3.msra.mxu1 %v1213_v13  ;;  %v1372_v13 = vld [vmem:[#allocation6 + $0x598] sm:$0xff] }
 0x261   : > { %2501 = vmatpush3.msra.mxu0 %v1068_v62  ;;  %2529 = vmatprep.subr.mxu1 %v1212_v17 }
 0x262   : > { %2502 = vmatprep.subr.mxu0 %v1067_v63  ;;  %2530 = vmatpush3.msra.mxu1 %v1212_v17  ;;  %v1370_v17 = vld [vmem:[#allocation6 + $0x588] sm:$0xff] }
 0x263   : > { %2503 = vmatpush3.msra.mxu0 %v1067_v63  ;;  %2531 = vmatprep.subr.mxu1 %v1211_v19 }
 0x264   : > { %2504 = vmatprep.subr.mxu0 %v1066_v0  ;;  %2532 = vmatpush3.msra.mxu1 %v1211_v19 }
 0x265   : > { %2505 = vmatpush3.msra.mxu0 %v1066_v0  ;;  %2533 = vmatprep.subr.mxu1 %v1210_v21 }
 0x266   : > { %2506 = vmatprep.subr.mxu0 %v1065_v1  ;;  %2534 = vmatpush3.msra.mxu1 %v1210_v21  ;;  %v1506_v21 = vld [vmem:[#allocation6 + $0x678] sm:$0xff] }
 0x267   : > { %2507 = vmatpush3.msra.mxu0 %v1065_v1  ;;  %2535 = vmatprep.subr.mxu1 %v1209_v22 }
 0x268   : > { %2508 = vmatprep.subr.mxu0 %v1064_v2  ;;  %2536 = vmatpush3.msra.mxu1 %v1209_v22  ;;  %v1524_v22 = vld [vmem:[#allocation6 + $0x6f0] sm:$0xff] }
 0x269   : > { %2509 = vmatpush3.msra.mxu0 %v1064_v2  ;;  %2537 = vmatprep.subr.mxu1 %v1208_v23  ;;  %v1383_v2 = vld [vmem:[#allocation6 + $0x5f0] sm:$0xff] }
 0x26a   : > { %2510 = vmatprep.subr.mxu0 %v1063_v3  ;;  %2538 = vmatpush3.msra.mxu1 %v1208_v23  ;;  %v1505_v23 = vld [vmem:[#allocation6 + $0x670] sm:$0xff] }
 0x26b   : > { %2511 = vmatpush3.msra.mxu0 %v1063_v3  ;;  %2539 = vmatprep.subr.mxu1 %v1207_v24  ;;  %v1382_v3 = vld [vmem:[#allocation6 + $0x5e8] sm:$0xff] }
 0x26c   : > { %2512 = vmatprep.subr.mxu0 %v1062_v4  ;;  %2540 = vmatpush3.msra.mxu1 %v1207_v24  ;;  %v1523_v24 = vld [vmem:[#allocation6 + $0x6e8] sm:$0xff] }
 0x26d   : > { %2513 = vmatpush3.msra.mxu0 %v1062_v4  ;;  %2541 = vmatprep.subr.mxu1 %v1206_v25  ;;  %v1381_v4 = vld [vmem:[#allocation6 + $0x5e0] sm:$0xff] }
 0x26e   : > { %2514 = vmatprep.subr.mxu0 %v1061_v5  ;;  %2542 = vmatpush3.msra.mxu1 %v1206_v25  ;;  %v1504_v25 = vld [vmem:[#allocation6 + $0x668] sm:$0xff] }
 0x26f   : > { %2515 = vmatpush3.msra.mxu0 %v1061_v5  ;;  %2543 = vmatprep.subr.mxu1 %v1205_v27 }
 0x270   : > { %2516 = vmatprep.subr.mxu0 %v1060_v6  ;;  %2544 = vmatpush3.msra.mxu1 %v1205_v27  ;;  %v1503_v27 = vld [vmem:[#allocation6 + $0x660] sm:$0xff] }
 0x271   : > { %2517 = vmatpush3.msra.mxu0 %v1060_v6  ;;  %2545 = vmatprep.subr.mxu1 %v1204_v29  ;;  %v1380_v6 = vld [vmem:[#allocation6 + $0x5d8] sm:$0xff] }
 0x272   : > { %2518 = vmatprep.subr.mxu0 %v1059_v7  ;;  %2546 = vmatpush3.msra.mxu1 %v1204_v29  ;;  %v1502_v29 = vld [vmem:[#allocation6 + $0x658] sm:$0xff] }
 0x273   : > { %2519 = vmatpush3.msra.mxu0 %v1059_v7  ;;  %2547 = vmatprep.subr.mxu1 %v1203_v31  ;;  %v1378_v7 = vld [vmem:[#allocation6 + $0x5c8] sm:$0xff] }
 0x274   : > { %2521 = vmatmul.mubr.f32.vlgmr.msra.gmra.mxu0 %v1057_v8  ;;  %2558 = vmatprep.subr.mxu0 %v1196_v10  ;;  %v1377_v8 = vld [vmem:[#allocation6 + $0x5c0] sm:$0xff] }
 0x275   : > { %2559 = vmatpush3.msra.mxu0 %v1196_v10  ;;  %2548 = vmatpush3.msra.mxu1 %v1203_v31  ;;  %v1375_v10 = vld [vmem:[#allocation6 + $0x5b0] sm:$0xff]  ;;  %v1519_v31 = vld [vmem:[#allocation6 + $0x6c8] sm:$0xff] }
 0x276   : > { %2560 = vmatprep.subr.mxu0 %v1195_v12  ;;  %2549 = vmatprep.subr.mxu1 %v1202_v33 }
 0x277   : > { %2561 = vmatpush3.msra.mxu0 %v1195_v12  ;;  %2550 = vmatpush3.msra.mxu1 %v1202_v33  ;;  %v1373_v12 = vld [vmem:[#allocation6 + $0x5a0] sm:$0xff]  ;;  %v1517_v33 = vld [vmem:[#allocation6 + $0x6b8] sm:$0xff] }
 0x278   : > { %2562 = vmatprep.subr.mxu0 %v1194_v14  ;;  %2551 = vmatprep.subr.mxu1 %v1201_v35 }
 0x279   : > { %2563 = vmatpush3.msra.mxu0 %v1194_v14  ;;  %2552 = vmatpush3.msra.mxu1 %v1201_v35  ;;  %v1371_v14 = vld [vmem:[#allocation6 + $0x590] sm:$0xff] }
 0x27a   : > { %2564 = vmatprep.subr.mxu0 %v1193_v18  ;;  %2553 = vmatprep.subr.mxu1 %v1200_v37  ;;  %v1501_v35 = vld [vmem:[#allocation6 + $0x650] sm:$0xff] }
 0x27b   : > { %2565 = vmatpush3.msra.mxu0 %v1193_v18  ;;  %2554 = vmatpush3.msra.mxu1 %v1200_v37  ;;  %v1369_v18 = vld [vmem:[#allocation6 + $0x580] sm:$0xff]  ;;  %v1500_v37 = vld [vmem:[#allocation6 + $0x648] sm:$0xff] }
 0x27c   : > { %2566 = vmatprep.subr.mxu0 %v1192_v20  ;;  %2593 = vmatprep.subr.mxu1 %v1384_v39 }
 0x27d   : > { %2567 = vmatpush3.msra.mxu0 %v1192_v20  ;;  %v1525_v20 = vld [vmem:[#allocation6 + $0x6f8] sm:$0xff] }
 0x27e   : > { %2568 = vmatprep.subr.mxu0 %v1191_v26 }
 0x27f   : > { %2569 = vmatpush3.msra.mxu0 %v1191_v26  ;;  %v1522_v26 = vld [vmem:[#allocation6 + $0x6e0] sm:$0xff] }
 0x280   : > { %2570 = vmatprep.subr.mxu0 %v1190_v28 }
 0x281   : > { %2571 = vmatpush3.msra.mxu0 %v1190_v28  ;;  %v1521_v28 = vld [vmem:[#allocation6 + $0x6d8] sm:$0xff] }
 0x282   : > { %2572 = vmatprep.subr.mxu0 %v1189_v30 }
 0x283   : > { %2573 = vmatpush3.msra.mxu0 %v1189_v30  ;;  %v1520_v30 = vld [vmem:[#allocation6 + $0x6d0] sm:$0xff] }
 0x284   : > { %2574 = vmatprep.subr.mxu0 %v1188_v32 }
 0x285   : > { %2575 = vmatpush3.msra.mxu0 %v1188_v32  ;;  %v1518_v32 = vld [vmem:[#allocation6 + $0x6c0] sm:$0xff] }
 0x286   : > { %2576 = vmatprep.subr.mxu0 %v1187_v34 }
 0x287   : > { %2577 = vmatpush3.msra.mxu0 %v1187_v34  ;;  %v1516_v34 = vld [vmem:[#allocation6 + $0x6b0] sm:$0xff] }
 0x288   : > { %2578 = vmatprep.subr.mxu0 %v1186_v36 }
 0x289   : > { %2579 = vmatpush3.msra.mxu0 %v1186_v36  ;;  %v1515_v36 = vld [vmem:[#allocation6 + $0x6a8] sm:$0xff] }
 0x28a   : > { %2580 = vmatprep.subr.mxu0 %v1185_v38 }
 0x28b   : > { %2581 = vmatpush3.msra.mxu0 %v1185_v38  ;;  %v1514_v38 = vld [vmem:[#allocation6 + $0x6a0] sm:$0xff] }
 0x28c   : > { %2582 = vmatprep.subr.mxu0 %v1184_v40 }
 0x28d   : > { %2583 = vmatpush3.msra.mxu0 %v1184_v40  ;;  %v1513_v40 = vld [vmem:[#allocation6 + $0x698] sm:$0xff] }
 0x28e   : > { %2584 = vmatprep.subr.mxu0 %v1183_v42 }
 0x28f   : > { %2585 = vmatpush3.msra.mxu0 %v1183_v42  ;;  %v1498_v42 = vld [vmem:[#allocation6 + $0x638] sm:$0xff] }
 0x290   : > { %2586 = vmatprep.subr.mxu0 %v1182_v44 }
 0x291   : > { %2587 = vmatpush3.msra.mxu0 %v1182_v44  ;;  %v1512_v44 = vld [vmem:[#allocation6 + $0x690] sm:$0xff] }
 0x292   : > { %2588 = vmatprep.subr.mxu0 %v1181_v45 }
 0x293   : > { %2589 = vmatpush3.msra.mxu0 %v1181_v45  ;;  %v1497_v45 = vld [vmem:[#allocation6 + $0x630] sm:$0xff] }
 0x294   : > { %2628 = vmatprep.subr.mxu0 %v1525_v20 }
 0x313   : > { %v2452_v46 = vpop.f32.mrf.mxu0 }
 0x315   : > { %v972_v48 = vpop.f32.mrf.mxu0 }
 0x31b   : > { %v2487_v47 = vpop.f32.mrf.mxu1 }
 0x31c   : > { %v1053_v50 = vadd.f32 %v2487_v47, %v2452_v46  ;;  %v1511_v46 = vld [vmem:[#allocation6 + $0x688] sm:$0xff] }
 0x31d   : > { %v1047_v49 = vpop.f32.mrf.mxu1  ;;  %v1496_v47 = vld [vmem:[#allocation6 + $0x628] sm:$0xff] }
 0x31e   : > { %v1048_v54 = vadd.f32 %v1047_v49, %v972_v48  ;;  %v1510_v48 = vld [vmem:[#allocation6 + $0x680] sm:$0xff] }
 0x31f   : > { %v1495_v49 = vld [vmem:[#allocation6 + $0x620] sm:$0xff] }
 0x334   : > { %v2522_v51 = vpop.f32.mrf.mxu0 }
 0x335   : > { %v1151_v56 = vadd.f32 %v2522_v51, %v1053_v50  ;;  %v1694_v50 = vld [vmem:[#allocation6 + $0x778] sm:$0xff] }
 0x336   : > { %v1141_v58 = vpop.f32.mrf.mxu0  ;;  %v1494_v51 = vld [vmem:[#allocation6 + $0x618] sm:$0xff] }
 0x337   : > { %v1161_v16 = vmul.f32 %v1922_v52, %v1151_v56  ;;  %v1150_v59 = vadd.f32 %v1141_v58, %v1048_v54  ;;  %v1492_v54 = vld [vmem:[#allocation6 + $0x608] sm:$0xff]  ;;  %v1491_v56 = vld [vmem:[#allocation6 + $0x600] sm:$0xff] }
 0x339   : > { %v1171_v60 = vadd.f32 %v1924_v57, %v1161_v16  ;;  %v1160_v61 = vmul.f32 %v1922_v52, %v1150_v59  ;;  %v1493_v52 = vld [vmem:[#allocation6 + $0x610] sm:$0xff] }
 0x33b   : > { %v1173_v15 = vmax.f32 %v1171_v60, 0.0  ;;  %v1170_v62 = vadd.f32 %v1924_v57, %v1160_v61 }
 0x33d   : > { %v3188_v63 = vadd.f32 %v1173_v15, %v3163_v41  ;;  %v1172_v0 = vmax.f32 %v1170_v62, 0.0  ;;  %v1925_v15 = vld [vmem:[#allocation8 + $0x3] ss:$0 sm:$0xff] }
 0x33f   : > { %1177 = vst [vmem:[#allocation2 + $0x10] sm:$0xff] %v3188_v63  ;;  %v3192_v1 = vadd.f32 %v1172_v0, %v3166_v43  ;;  %v1379_v43 = vld [vmem:[#allocation6 + $0x5d0] sm:$0xff] }
 0x341   : > { %1176 = vst [vmem:[#allocation2 + $0x8] sm:$0xff] %v3192_v1  ;;  %2555 = vmatprep.mubr.f32.mxu1 %v3192_v1 }
 0x342   : > { %2556 = vmatmul.mubr.f32.vlgmr.msra.gmra.mxu1 %v3188_v63 }
 0x343   : > { %2594 = vmatpush3.msra.mxu1 %v1384_v39  ;;  %v1499_v39 = vld [vmem:[#allocation6 + $0x640] sm:$0xff] }
 0x344   : > { %2595 = vmatprep.subr.mxu1 %v1383_v2 }
 0x345   : > { %2596 = vmatpush3.msra.mxu1 %v1383_v2  ;;  %v1927_v2 = vld [vmem:[%s3261_s3 + $0x3] ss:$0 sm:$0xff] }
 0x346   : > { %2597 = vmatprep.subr.mxu1 %v1382_v3  ;;  %v1367_v19 = vld [vmem:[#allocation2 + $0x14] sm:$0xff] }
 0x347   : > { %2598 = vmatpush3.msra.mxu1 %v1382_v3 }
 0x348   : > { %v1178_v41 = vld [vmem:[#allocation2 + $0x4] sm:$0xff]  ;;  %v1179_v5 = vld [vmem:[#allocation2 + $0xc] sm:$0xff]  ;;  %2599 = vmatprep.subr.mxu1 %v1381_v4 }
 0x349   : > { %2590 = vmatprep.mubr.f32.mxu0 %v1178_v41  ;;  %2625 = vmatprep.mubr.f32.mxu1 %v1179_v5 }
 0x34a   : > { %2591 = vmatmul.mubr.f32.vlgmr.msra.gmra.mxu0 %v1179_v5  ;;  %2600 = vmatpush3.msra.mxu1 %v1381_v4 }
 0x34b   : > { %2601 = vmatprep.subr.mxu1 %v1380_v6  ;;  %2629 = vmatpush3.msra.mxu0 %v1525_v20  ;;  %v1687_v20 = vld [vmem:[#allocation6 + $0x740] sm:$0xff] }
 0x34c   : > { %2602 = vmatpush3.msra.mxu1 %v1380_v6  ;;  %2630 = vmatprep.subr.mxu0 %v1524_v22 }
 0x34d   : > { %2603 = vmatprep.subr.mxu1 %v1379_v43  ;;  %2631 = vmatpush3.msra.mxu0 %v1524_v22  ;;  %v1685_v22 = vld [vmem:[#allocation6 + $0x730] sm:$0xff] }
 0x34e   : > { %2604 = vmatpush3.msra.mxu1 %v1379_v43  ;;  %2632 = vmatprep.subr.mxu0 %v1523_v24 }
 0x34f   : > { %2605 = vmatprep.subr.mxu1 %v1378_v7  ;;  %2633 = vmatpush3.msra.mxu0 %v1523_v24  ;;  %v1683_v24 = vld [vmem:[#allocation6 + $0x720] sm:$0xff] }
 0x350   : > { %2606 = vmatpush3.msra.mxu1 %v1378_v7  ;;  %2634 = vmatprep.subr.mxu0 %v1522_v26 }
 0x351   : > { %2607 = vmatprep.subr.mxu1 %v1377_v8  ;;  %2635 = vmatpush3.msra.mxu0 %v1522_v26  ;;  %v1681_v26 = vld [vmem:[#allocation6 + $0x710] sm:$0xff] }
 0x352   : > { %2608 = vmatpush3.msra.mxu1 %v1377_v8  ;;  %2636 = vmatprep.subr.mxu0 %v1521_v28 }
 0x353   : > { %2609 = vmatprep.subr.mxu1 %v1376_v9  ;;  %2637 = vmatpush3.msra.mxu0 %v1521_v28  ;;  %v1679_v28 = vld [vmem:[#allocation6 + $0x700] sm:$0xff] }
 0x354   : > { %2610 = vmatpush3.msra.mxu1 %v1376_v9  ;;  %2638 = vmatprep.subr.mxu0 %v1520_v30 }
 0x355   : > { %2611 = vmatprep.subr.mxu1 %v1375_v10  ;;  %2639 = vmatpush3.msra.mxu0 %v1520_v30 }
 0x356   : > { %2612 = vmatpush3.msra.mxu1 %v1375_v10  ;;  %2640 = vmatprep.subr.mxu0 %v1519_v31 }
 0x357   : > { %2613 = vmatprep.subr.mxu1 %v1374_v11  ;;  %2641 = vmatpush3.msra.mxu0 %v1519_v31 }
 0x358   : > { %2614 = vmatpush3.msra.mxu1 %v1374_v11  ;;  %2642 = vmatprep.subr.mxu0 %v1518_v32  ;;  %v1693_v11 = vld [vmem:[#allocation6 + $0x770] sm:$0xff] }
 0x359   : > { %2615 = vmatprep.subr.mxu1 %v1373_v12  ;;  %2643 = vmatpush3.msra.mxu0 %v1518_v32 }
 0x35a   : > { %2616 = vmatpush3.msra.mxu1 %v1373_v12  ;;  %2644 = vmatprep.subr.mxu0 %v1517_v33  ;;  %v1692_v12 = vld [vmem:[#allocation6 + $0x768] sm:$0xff] }
 0x35b   : > { %2617 = vmatprep.subr.mxu1 %v1372_v13  ;;  %2645 = vmatpush3.msra.mxu0 %v1517_v33 }
 0x35c   : > { %2618 = vmatpush3.msra.mxu1 %v1372_v13  ;;  %2646 = vmatprep.subr.mxu0 %v1516_v34  ;;  %v1691_v13 = vld [vmem:[#allocation6 + $0x760] sm:$0xff] }
 0x35d   : > { %2619 = vmatprep.subr.mxu1 %v1371_v14  ;;  %2647 = vmatpush3.msra.mxu0 %v1516_v34 }
 0x35e   : > { %2620 = vmatpush3.msra.mxu1 %v1371_v14  ;;  %2648 = vmatprep.subr.mxu0 %v1515_v36  ;;  %v1690_v14 = vld [vmem:[#allocation6 + $0x758] sm:$0xff] }
 0x35f   : > { %2621 = vmatprep.subr.mxu1 %v1370_v17  ;;  %2649 = vmatpush3.msra.mxu0 %v1515_v36  ;;  %v1928_v36 = vld [vmem:[#allocation8 + $0x4] ss:$0 sm:$0xff] }
 0x360   : > { %2622 = vmatpush3.msra.mxu1 %v1370_v17  ;;  %2650 = vmatprep.subr.mxu0 %v1514_v38 }
 0x361   : > { %2623 = vmatprep.subr.mxu1 %v1369_v18  ;;  %2651 = vmatpush3.msra.mxu0 %v1514_v38 }
 0x362   : > { %2624 = vmatpush3.msra.mxu1 %v1369_v18  ;;  %2652 = vmatprep.subr.mxu0 %v1513_v40 }
 0x363   : > { %2626 = vmatmul.mubr.f32.vlgmr.msra.gmra.mxu1 %v1367_v19  ;;  %2663 = vmatprep.subr.mxu1 %v1506_v21 }
 0x364   : > { %2664 = vmatpush3.msra.mxu1 %v1506_v21  ;;  %2653 = vmatpush3.msra.mxu0 %v1513_v40  ;;  %v1686_v21 = vld [vmem:[#allocation6 + $0x738] sm:$0xff] }
 0x365   : > { %2665 = vmatprep.subr.mxu1 %v1505_v23  ;;  %2654 = vmatprep.subr.mxu0 %v1512_v44 }
 0x366   : > { %2666 = vmatpush3.msra.mxu1 %v1505_v23  ;;  %2655 = vmatpush3.msra.mxu0 %v1512_v44  ;;  %v1684_v23 = vld [vmem:[#allocation6 + $0x728] sm:$0xff] }
 0x367   : > { %2667 = vmatprep.subr.mxu1 %v1504_v25  ;;  %2656 = vmatprep.subr.mxu0 %v1511_v46 }
 0x368   : > { %2668 = vmatpush3.msra.mxu1 %v1504_v25  ;;  %2657 = vmatpush3.msra.mxu0 %v1511_v46  ;;  %v1682_v25 = vld [vmem:[#allocation6 + $0x718] sm:$0xff] }
 0x369   : > { %2669 = vmatprep.subr.mxu1 %v1503_v27  ;;  %2658 = vmatprep.subr.mxu0 %v1510_v48 }
 0x36a   : > { %2670 = vmatpush3.msra.mxu1 %v1503_v27  ;;  %2659 = vmatpush3.msra.mxu0 %v1510_v48  ;;  %v1680_v27 = vld [vmem:[#allocation6 + $0x708] sm:$0xff] }
 0x36b   : > { %2671 = vmatprep.subr.mxu1 %v1502_v29  ;;  %2698 = vmatprep.subr.mxu0 %v1694_v50 }
 0x36c   : > { %2672 = vmatpush3.msra.mxu1 %v1502_v29 }
 0x36d   : > { %2673 = vmatprep.subr.mxu1 %v1501_v35 }
 0x36e   : > { %2674 = vmatpush3.msra.mxu1 %v1501_v35 }
 0x36f   : > { %2675 = vmatprep.subr.mxu1 %v1500_v37 }
 0x370   : > { %2676 = vmatpush3.msra.mxu1 %v1500_v37 }
 0x371   : > { %2677 = vmatprep.subr.mxu1 %v1499_v39 }
 0x372   : > { %2678 = vmatpush3.msra.mxu1 %v1499_v39  ;;  %v1930_v39 = vld [vmem:[%s3261_s3 + $0x4] ss:$0 sm:$0xff] }
 0x373   : > { %2679 = vmatprep.subr.mxu1 %v1498_v42 }
 0x374   : > { %2680 = vmatpush3.msra.mxu1 %v1498_v42 }
 0x375   : > { %2681 = vmatprep.subr.mxu1 %v1497_v45 }
 0x376   : > { %2682 = vmatpush3.msra.mxu1 %v1497_v45 }
 0x377   : > { %2683 = vmatprep.subr.mxu1 %v1496_v47 }
 0x378   : > { %2684 = vmatpush3.msra.mxu1 %v1496_v47 }
 0x379   : > { %2685 = vmatprep.subr.mxu1 %v1495_v49 }
 0x37a   : > { %2686 = vmatpush3.msra.mxu1 %v1495_v49 }
 0x37b   : > { %2687 = vmatprep.subr.mxu1 %v1494_v51 }
 0x37c   : > { %2688 = vmatpush3.msra.mxu1 %v1494_v51 }
 0x37d   : > { %2689 = vmatprep.subr.mxu1 %v1493_v52 }
 0x37e   : > { %2690 = vmatpush3.msra.mxu1 %v1493_v52 }
 0x37f   : > { %2691 = vmatprep.subr.mxu1 %v1492_v54 }
 0x380   : > { %2692 = vmatpush3.msra.mxu1 %v1492_v54 }
 0x381   : > { %2693 = vmatprep.subr.mxu1 %v1491_v56 }
 0x382   : > { %2694 = vmatpush3.msra.mxu1 %v1491_v56 }
 0x402   : > { %v2557_v57 = vpop.f32.mrf.mxu1 }
 0x404   : > { %v1282_v16 = vpop.f32.mrf.mxu1 }
 0x40a   : > { %v2592_v58 = vpop.f32.mrf.mxu0 }
 0x40b   : > { %v1363_v60 = vadd.f32 %v2592_v58, %v2557_v57 }
 0x40c   : > { %v1357_v59 = vpop.f32.mrf.mxu0 }
 0x40d   : > { %v1358_v62 = vadd.f32 %v1357_v59, %v1282_v16 }
 0x423   : > { %v2627_v61 = vpop.f32.mrf.mxu1 }
 0x424   : > { %v1461_v0 = vadd.f32 %v2627_v61, %v1363_v60 }
 0x425   : > { %v1451_v3 = vpop.f32.mrf.mxu1 }
 0x426   : > { %v1471_v4 = vmul.f32 %v1925_v15, %v1461_v0  ;;  %v1460_v41 = vadd.f32 %v1451_v3, %v1358_v62 }
 0x428   : > { %v1481_v5 = vadd.f32 %v1927_v2, %v1471_v4  ;;  %v1470_v6 = vmul.f32 %v1925_v15, %v1460_v41 }
 0x42a   : > { %v1483_v43 = vmax.f32 %v1481_v5, 0.0  ;;  %v1480_v7 = vadd.f32 %v1927_v2, %v1470_v6 }
 0x42c   : > { %v1485_v8 = vadd.f32 %v1483_v43, %v3175_v53  ;;  %v1482_v9 = vmax.f32 %v1480_v7, 0.0  ;;  %v1689_v53 = vld [vmem:[#allocation6 + $0x750] sm:$0xff] }
 0x42e   : > { %1487 = vst [vmem:[#allocation2 + $0x10] sm:$0xff] %v1485_v8  ;;  %v1484_v10 = vadd.f32 %v1482_v9, %v3179_v55  ;;  %v1688_v55 = vld [vmem:[#allocation6 + $0x748] sm:$0xff] }
 0x430   : > { %1486 = vst [vmem:[#allocation2 + $0x8] sm:$0xff] %v1484_v10  ;;  %2660 = vmatprep.mubr.f32.mxu0 %v1484_v10 }
 0x431   : > { %2661 = vmatmul.mubr.f32.vlgmr.msra.gmra.mxu0 %v1485_v8 }
 0x432   : > { %2699 = vmatpush3.msra.mxu0 %v1694_v50 }
 0x433   : > { %2700 = vmatprep.subr.mxu0 %v1693_v11 }
 0x434   : > { %2701 = vmatpush3.msra.mxu0 %v1693_v11 }
 0x435   : > { %2702 = vmatprep.subr.mxu0 %v1692_v12  ;;  %v1677_v29 = vld [vmem:[#allocation2 + $0x11] sm:$0xff] }
 0x436   : > { %2703 = vmatpush3.msra.mxu0 %v1692_v12 }
 0x437   : > { %v1488_v17 = vld [vmem:[#allocation2 + $0x7] sm:$0xff]  ;;  %v1489_v18 = vld [vmem:[#allocation2 + $0xf] sm:$0xff]  ;;  %2704 = vmatprep.subr.mxu0 %v1691_v13 }
 0x438   : > { %v1676_v19 = vld [vmem:[#allocation2 + $0x9] sm:$0xff]  ;;  %2695 = vmatprep.mubr.f32.mxu1 %v1488_v17  ;;  %2705 = vmatpush3.msra.mxu0 %v1691_v13 }
 0x439   : > { %2730 = vmatprep.mubr.f32.mxu0 %v1676_v19  ;;  %2696 = vmatmul.mubr.f32.vlgmr.msra.gmra.mxu1 %v1489_v18 }
 0x43a   : > { %2706 = vmatprep.subr.mxu0 %v1690_v14 }
 0x43b   : > { %2707 = vmatpush3.msra.mxu0 %v1690_v14 }
 0x43c   : > { %2708 = vmatprep.subr.mxu0 %v1689_v53 }
 0x43d   : > { %2709 = vmatpush3.msra.mxu0 %v1689_v53 }
 0x43e   : > { %2710 = vmatprep.subr.mxu0 %v1688_v55 }
 0x43f   : > { %2711 = vmatpush3.msra.mxu0 %v1688_v55 }
 0x440   : > { %2712 = vmatprep.subr.mxu0 %v1687_v20 }
 0x441   : > { %2713 = vmatpush3.msra.mxu0 %v1687_v20 }
 0x442   : > { %2714 = vmatprep.subr.mxu0 %v1686_v21 }
 0x443   : > { %2715 = vmatpush3.msra.mxu0 %v1686_v21 }
 0x444   : > { %2716 = vmatprep.subr.mxu0 %v1685_v22 }
 0x445   : > { %2717 = vmatpush3.msra.mxu0 %v1685_v22 }
 0x446   : > { %2718 = vmatprep.subr.mxu0 %v1684_v23 }
 0x447   : > { %2719 = vmatpush3.msra.mxu0 %v1684_v23 }
 0x448   : > { %2720 = vmatprep.subr.mxu0 %v1683_v24 }
 0x449   : > { %2721 = vmatpush3.msra.mxu0 %v1683_v24 }
 0x44a   : > { %2722 = vmatprep.subr.mxu0 %v1682_v25 }
 0x44b   : > { %2723 = vmatpush3.msra.mxu0 %v1682_v25 }
 0x44c   : > { %2724 = vmatprep.subr.mxu0 %v1681_v26 }
 0x44d   : > { %2725 = vmatpush3.msra.mxu0 %v1681_v26 }
 0x44e   : > { %2726 = vmatprep.subr.mxu0 %v1680_v27 }
 0x44f   : > { %2727 = vmatpush3.msra.mxu0 %v1680_v27 }
 0x450   : > { %2728 = vmatprep.subr.mxu0 %v1679_v28 }
 0x451   : > { %2729 = vmatpush3.msra.mxu0 %v1679_v28 }
 0x452   : > { %2731 = vmatmul.mubr.f32.vlgmr.msra.gmra.mxu0 %v1677_v29 }
 0x4f1   : > { %v2662_v30 = vpop.f32.mrf.mxu0 }
 0x4f3   : > { %v1592_v32 = vpop.f32.mrf.mxu0 }
 0x4f9   : > { %v2697_v31 = vpop.f32.mrf.mxu1 }
 0x4fa   : > { %v1673_v34 = vadd.f32 %v2697_v31, %v2662_v30 }
 0x4fb   : > { %v1667_v33 = vpop.f32.mrf.mxu1 }
 0x4fc   : > { %v1668_v37 = vadd.f32 %v1667_v33, %v1592_v32 }
 0x512   : > { %v2732_v35 = vpop.f32.mrf.mxu0 }
 0x513   : > { %v1771_v38 = vadd.f32 %v2732_v35, %v1673_v34 }
 0x514   : > { %v1761_v40 = vpop.f32.mrf.mxu0 }
 0x515   : > { %v1781_v42 = vmul.f32 %v1928_v36, %v1771_v38  ;;  %v1770_v44 = vadd.f32 %v1761_v40, %v1668_v37 }
 0x517   : > { %v1791_v45 = vadd.f32 %v1930_v39, %v1781_v42  ;;  %v1780_v46 = vmul.f32 %v1928_v36, %v1770_v44 }
 0x519   : > { %v1793_v47 = vmax.f32 %v1791_v45, 0.0  ;;  %v1790_v48 = vadd.f32 %v1930_v39, %v1780_v46 }
 0x51b   : > { %v1795_v49 = vadd.f32 %v1793_v47, %v3188_v63  ;;  %v1792_v50 = vmax.f32 %v1790_v48, 0.0 }
 0x51d   : > { %1797 = vst [vmem:[%s244_s9 + $0x8] sm:$0xff] %v1795_v49  ;;  %v1794_v51 = vadd.f32 %v1792_v50, %v3192_v1 }
 0x51f   : > { %1796 = vst [vmem:[%s244_s9] sm:$0xff] %v1794_v51 }
 0x520   : > { %2900 = shalt.err (!%p2897_p5)
}
 0x521   : > { %s2901_s8 = scalar_lea.hbm %s3212_s21, 256  ;;  %s2905_s28 = scalar_lea.hbm %s3262_s4, 512 }
 0x522   : > { %p2902_p11 = scmp.ne.s32.totalorder %s3212_s21, %s2901_s8  ;;  %p2906_p4 = scmp.lt.s32.totalorder %s3212_s21, %s3262_s4 }
 0x523   : > { %p2907_p6 = scmp.lt.s32.totalorder %s2905_s28, %s2901_s8 }
 0x524   : > { %p2903_p9 = pnand %p2902_p11, %p3277_p2 }
 0x525   : > { %p2908_p8 = por %p2907_p6, %p2906_p4 }
 0x526   : > { %p2904_p1 = pneg %p2903_p9 }
 0x528   : > { %p2909_p3 = pnand %p2908_p8, %p2904_p1 }
 0x52a   : > { %2912 = shalt.err (!%p2909_p3)
}
 0x52b   : > { %s2966_s7 = smov 128   ;;  %s2967_s9 = smov 8  }
 0x52c   : > { %2743 = dma.vmem_to_hbm [thread:$0]  (%p3277_p2), %s3214_s20, 256, %s3212_s21, %s1799_s19, %s2966_s7, %s2966_s7, %s2967_s9  }
 0x52d PF: > { %s1827_s29 = sand.u32 1, %s2943_s15   ;;  %p3278_p7 = scmp.ne.s32.totalorder %s3268_s22, 0 }
 0x52e   : > { %p3279_p12 = scmp.ge.s32.totalorder %s2955_s18, 2  ;;  %s1828_s11 = scalar_lea.sflag [#allocation5], %s1827_s29 }
 0x530   : > { %p2757_p13 = pnand %p3279_p12, %p3278_p7 }
 0x532   : > { %p2758_p10 = pneg %p2757_p13 }
 0x534   : > { %2938 = dma.done.wait (%p2758_p10), %s1828_s11, 256  }
 0x535   : > { %2940 = vsyncadd (%p2758_p10), %s1828_s11, 4294967040  ;;  %p18_p0 = scmp.ge.s32.totalorder %s3076_s14, 4   ;;  %s3280_s15 = smov %s2947_s16 }
 0x536   : > { %s3281_s16 = smov %s2951_s17  ;;  %s3282_s17 = smov %s3085_s25 }
 0x537   : > { %s3283_s18 = smov %s3076_s14  ;;  %20 = sbr.rel (!%p18_p0) target bundleno = 6 (0x6), region = 111 }
 0x53c   :  { %1833 = vsyncpa [#allocation4], 1 }
 0x53d   :  { %1835 = vsyncpa [#allocation4 + $0x1], 1 }
 0x53e   :  { %1836 = vsyncpa [#allocation7], 1 }
 0x53f   :  { %1837 = vsyncpa [#allocation5], 1 }
 0x540   :  { %1839 = vsyncpa [#allocation5 + $0x1], 1 }

</bundles_post_ra>
